<compile_context>
chip_gen: v7x
topology: tpu7x:2x2x1
jax: 0.10.0
libtpu: 0.0.40
codegen_flags: <defaults>
</compile_context>

<pallas_src>
import functools

import jax
import jax.numpy as jnp
from jax.experimental import pallas as pl
from jax.experimental.pallas import tpu as pltpu

C_PAD = 128    # lane-dense padded channel width (== MXU tile width)
N_ALIGN = 512  # node-dim padding granularity -> big aggregation tiles


def _round_up(x, m):
    return (x + m - 1) // m * m


def _pick_tiles(n_pad):
    """Row tile TM and reduction tile TK for the aggregation kernel.

    n_pad is always a multiple of N_ALIGN (512).  TM=512 keeps the f32
    accumulator at 256 KiB; TK up to 2048 gives 2 MiB A_hat tiles per buffer,
    which (double-buffered + resident XW) stays well inside the v7x 64 MiB
    per-TC VMEM while sitting near the HBM roofline on all generations.
    """
    tm = min(512, n_pad)
    tk = 512
    for cand in (2048, 1024, 512):
        if n_pad % cand == 0:
            tk = cand
            break
    return tm, min(tk, n_pad)


# ---------------------------------------------------------------------------
# Aggregation kernel: out = epilogue(A_hat @ XW + b), tiled over (rows, red.).
#   * XW is resident in VMEM (constant block) and sliced per reduction step.
#   * Optional fused epilogue: out = relu(acc + b) @ W2   (layer 1 + proj 2).
# ---------------------------------------------------------------------------
def _agg_kernel(*refs, apply_relu, fuse_w2, tk):
    if fuse_w2:
        a_ref, xw_ref, b_ref, w2_ref, o_ref, acc_ref = refs
    else:
        a_ref, xw_ref, b_ref, o_ref, acc_ref = refs

    k = pl.program_id(1)

    @pl.when(k == 0)
    def _():
        acc_ref[...] = jnp.zeros_like(acc_ref)

    ks = pl.multiple_of(k * tk, tk)
    acc_ref[...] += jnp.dot(a_ref[...], xw_ref[pl.ds(ks, tk), :],
                            preferred_element_type=jnp.float32)

    @pl.when(k == pl.num_programs(1) - 1)
    def _():
        out = acc_ref[...] + b_ref[...]
        if apply_relu:
            out = jnp.maximum(out, 0.0)
        if fuse_w2:
            # Fused h @ W2: 128x128 bf16 weight resident in VMEM; negligible
            # MXU work, hides under the mem-bound main loop, and saves a full
            # HBM round-trip of h plus one pallas_call.
            out = jnp.dot(out.astype(jnp.bfloat16), w2_ref[...],
                          preferred_element_type=jnp.float32)
        o_ref[...] = out.astype(o_ref.dtype)


def aggregate(a_hat, xw, b, w2=None, *, relu, out_dtype, tm, tk):
    """a_hat:[N_pad,N_pad] bf16, xw:[N_pad,C_PAD] bf16, b:[1,C_PAD] f32,
    w2: optional [C_PAD,C_PAD] bf16 fused into the epilogue."""
    n_pad = a_hat.shape[0]
    fuse_w2 = w2 is not None
    kernel = functools.partial(_agg_kernel, apply_relu=relu,
                               fuse_w2=fuse_w2, tk=tk)

    in_specs = [
        # A_hat row/reduction tile, streamed (dominant HBM stream).
        pl.BlockSpec((tm, tk), lambda i, k: (i, k)),
        # XW fully resident in VMEM: constant index_map -> fetched once.
        pl.BlockSpec((n_pad, C_PAD), lambda i, k: (0, 0)),
        # Bias, constant.
        pl.BlockSpec((1, C_PAD), lambda i, k: (0, 0)),
    ]
    inputs = [a_hat, xw, b]
    if fuse_w2:
        in_specs.append(pl.BlockSpec((C_PAD, C_PAD), lambda i, k: (0, 0)))
        inputs.append(w2)

    # VMEM budget (worst case assumes 2 buffers even for constant blocks);
    # cap at 56 MiB so the same config fits v7x's 64 MiB per-TC VMEM.
    out_itemsize = jnp.dtype(out_dtype).itemsize
    est = (2 * tm * tk * 2               # A_hat tiles, double-buffered bf16
           + 2 * n_pad * C_PAD * 2       # resident XW
           + tm * C_PAD * 4              # f32 accumulator scratch
           + 2 * tm * C_PAD * out_itemsize   # output tiles
           + 2 * C_PAD * C_PAD * 2       # fused W2
           + 2 * 8 * C_PAD * 4)          # bias
    vmem_limit = int(min(56 * 2**20, max(32 * 2**20, 2 * est)))

    return pl.pallas_call(
        kernel,
        out_shape=jax.ShapeDtypeStruct((n_pad, C_PAD), out_dtype),
        grid=(n_pad // tm, n_pad // tk),
        in_specs=in_specs,
        out_specs=pl.BlockSpec((tm, C_PAD), lambda i, k: (i, 0)),
        scratch_shapes=[pltpu.VMEM((tm, C_PAD), jnp.float32)],
        compiler_params=pltpu.CompilerParams(
            dimension_semantics=("parallel", "arbitrary"),
            vmem_limit_bytes=vmem_limit),
    )(*inputs)


# ---------------------------------------------------------------------------
# Glue: dense normalized adjacency (plain JAX).
# ---------------------------------------------------------------------------
def build_normalized_adjacency(edge_index, num_nodes):
    """Dense D^{-1/2}(A + I)D^{-1/2} from edge_index [2, E]."""
    src = edge_index[0]
    dst = edge_index[1]
    a = jnp.zeros((num_nodes, num_nodes), jnp.float32)
    # message passing: destination aggregates from source -> A[dst, src] = 1
    # NOTE: assumes edge_index has no explicit self-loops / duplicate edges.
    a = a.at[dst, src].set(1.0)
    a = a + jnp.eye(num_nodes, dtype=jnp.float32)  # self-loops
    deg = a.sum(axis=1)
    dinv = jnp.where(deg > 0, 1.0 / jnp.sqrt(deg), 0.0)
    return dinv[:, None] * a * dinv[None, :]


def gcn_forward(x, edge_index, params):
    n, c_in = x.shape
    hidden = params["w1"].shape[1]
    c_out = params["w2"].shape[1]
    assert hidden <= C_PAD and c_out <= C_PAD
    n_pad = _round_up(n, N_ALIGN)
    tm, tk = _pick_tiles(n_pad)

    # Normalized adjacency, zero-padded + bf16 (glue, plain JAX).
    a_hat = build_normalized_adjacency(edge_index, n)
    a_pad = jnp.zeros((n_pad, n_pad), jnp.bfloat16)
    a_pad = a_pad.at[:n, :n].set(a_hat.astype(jnp.bfloat16))

    # XW1 = X @ W1 in plain JAX/XLA (K = c_in is tiny / lane-sparse on the
    # MXU; a dedicated pallas_call would be pure launch + DMA overhead).
    xw1 = x @ params["w1"]                                     # f32 [n, hidden]
    xw1_pad = jnp.zeros((n_pad, C_PAD), jnp.bfloat16)
    xw1_pad = xw1_pad.at[:n, :hidden].set(xw1.astype(jnp.bfloat16))

    b1_pad = jnp.zeros((1, C_PAD), jnp.float32).at[0, :hidden].set(params["b1"])
    w2_pad = jnp.zeros((C_PAD, C_PAD), jnp.bfloat16)
    w2_pad = w2_pad.at[:hidden, :c_out].set(params["w2"].astype(jnp.bfloat16))
    b2_pad = jnp.zeros((1, C_PAD), jnp.float32).at[0, :c_out].set(params["b2"])

    # Layer 1 with fused layer-2 projection in the epilogue:
    #   xw2 = relu(A_hat @ XW1 + b1) @ W2       (h never touches HBM)
    xw2 = aggregate(a_pad, xw1_pad, b1_pad, w2_pad,
                    relu=True, out_dtype=jnp.bfloat16, tm=tm, tk=tk)
    # dropout(p=0.3): identity in eval mode.
    # Layer 2 aggregation: y = A_hat @ xw2 + b2.
    y = aggregate(a_pad, xw2, b2_pad, None,
                  relu=False, out_dtype=jnp.float32, tm=tm, tk=tk)
    return y[:n, :c_out]


def gcn_forward_reference(x, edge_index, params):
    """Pure-JAX f32 reference for tolerance checking."""
    a_hat = build_normalized_adjacency(edge_index, x.shape[0])
    h = jnp.maximum(a_hat @ (x @ params["w1"]) + params["b1"], 0.0)
    return a_hat @ (h @ params["w2"]) + params["b2"]


def init_params(key, in_channels, hidden_channels, out_channels):
    k1, k2 = jax.random.split(key)
    # Glorot-style deterministic init (GCNConv uses glorot weights, zero bias).
    s1 = jnp.sqrt(6.0 / (in_channels + hidden_channels))
    s2 = jnp.sqrt(6.0 / (hidden_channels + out_channels))
    return {
        "w1": jax.random.uniform(k1, (in_channels, hidden_channels),
                                 jnp.float32, -s1, s1),
        "b1": jnp.zeros((hidden_channels,), jnp.float32),
        "w2": jax.random.uniform(k2, (hidden_channels, out_channels),
                                 jnp.float32, -s2, s2),
        "b2": jnp.zeros((out_channels,), jnp.float32),
    }


if __name__ == "__main__":
    key = jax.random.PRNGKey(0)
    kx, kp = jax.random.split(key)

    num_nodes = 16
    in_channels = 8
    hidden_channels = 32
    out_channels = 4

    # Deterministic node features [N, C_in].
    x = jax.random.normal(kx, (num_nodes, in_channels), jnp.float32)

    # Deterministic ring graph, both directions: edge_index [2, E].
    src = jnp.arange(num_nodes, dtype=jnp.int32)
    dst = (src + 1) % num_nodes
    edge_index = jnp.stack(
        [jnp.concatenate([src, dst]), jnp.concatenate([dst, src])], axis=0)

    params = init_params(kp, in_channels, hidden_channels, out_channels)

    out = gcn_forward(x, edge_index, params)
    out = jax.block_until_ready(out)
    ref = jax.block_until_ready(gcn_forward_reference(x, edge_index, params))

    assert out.shape == (num_nodes, out_channels)
    assert jnp.all(jnp.isfinite(out))
    # bf16 operands -> loose tolerance vs f32 reference.
    assert jnp.allclose(out, ref, atol=0.1, rtol=0.05)
    print("KERNEL_OK")
</pallas_src>

<mosaic_0001>
module attributes {stable_mosaic.version = 11 : i64} {
  func.func @_agg_kernel(%arg0: i32, %arg1: i32, %arg2: memref<512x512xbf16, #tpu.memory_space<vmem>>, %arg3: memref<512x128xbf16, #tpu.memory_space<vmem>>, %arg4: memref<1x128xf32, #tpu.memory_space<vmem>>, %arg5: memref<128x128xbf16, #tpu.memory_space<vmem>>, %arg6: memref<512x128xbf16, #tpu.memory_space<vmem>>, %arg7: memref<512x128xf32, #tpu.memory_space<vmem>>) attributes {dimension_semantics = [#tpu.dimension_semantics<parallel>, #tpu.dimension_semantics<arbitrary>], iteration_bounds = array<i64: 1, 1>, scalar_prefetch = 0 : i64, scratch_operands = 1 : i64, tpu.core_type = #tpu.core_type<tc>, window_params = [{transform_indices = @transform_0, window_bounds = array<i64: 512, 512>}, {pipeline_mode = #tpu.pipeline_mode<synchronous>, transform_indices = @transform_1, window_bounds = array<i64: 512, 128>}, {pipeline_mode = #tpu.pipeline_mode<synchronous>, transform_indices = @transform_2, window_bounds = array<i64: 1, 128>}, {pipeline_mode = #tpu.pipeline_mode<synchronous>, transform_indices = @transform_3, window_bounds = array<i64: 128, 128>}, {transform_indices = @transform_4, window_bounds = array<i64: 512, 128>}]} {
    %c0_i32 = arith.constant 0 : i32
    %0 = arith.cmpi eq, %arg1, %c0_i32 : i32
    %1 = arith.extui %0 : i1 to i32
    %c0_i32_0 = arith.constant 0 : i32
    %2 = arith.cmpi ne, %1, %c0_i32_0 : i32
    scf.if %2 {
      %cst_9 = arith.constant 0.000000e+00 : f32
      %15 = vector.broadcast %cst_9 : f32 to vector<512x128xf32>
      %c0_10 = arith.constant 0 : index
      %c0_11 = arith.constant 0 : index
      %16 = vector.load %arg7[%c0_10, %c0_11] : memref<512x128xf32, #tpu.memory_space<vmem>>, vector<512x128xf32>
      tpu.vector_store %arg7[%c0_10, %c0_11], %15 {strides = array<i32>} : memref<512x128xf32, #tpu.memory_space<vmem>>, vector<512x128xf32>,
    } else {
    }
    %c512_i32 = arith.constant 512 : i32
    %3 = arith.muli %arg1, %c512_i32 : i32
    %4 = tpu.assume_multiple %3, 512 : i32
    %c0 = arith.constant 0 : index
    %c0_1 = arith.constant 0 : index
    %5 = vector.load %arg7[%c0, %c0_1] : memref<512x128xf32, #tpu.memory_space<vmem>>, vector<512x128xf32>
    %c0_2 = arith.constant 0 : index
    %c0_3 = arith.constant 0 : index
    %6 = vector.load %arg2[%c0_2, %c0_3] : memref<512x512xbf16, #tpu.memory_space<vmem>>, vector<512x512xbf16>
    %7 = arith.index_cast %4 : i32 to index
    %c0_4 = arith.constant 0 : index
    %8 = vector.load %arg3[%7, %c0_4] : memref<512x128xbf16, #tpu.memory_space<vmem>>, vector<512x128xbf16>
    %cst = arith.constant dense<0.000000e+00> : vector<512x128xf32>
    %9 = tpu.matmul %6, %8, %cst {dimension_numbers = #tpu.dot_dimension_numbers<[1], [0], [0], [1], [0, 0, 1, 1], [], []>} : vector<512x512xbf16>, vector<512x128xbf16>, vector<512x128xf32> -> vector<512x128xf32>
    %10 = arith.addf %5, %9 : vector<512x128xf32>
    %c0_5 = arith.constant 0 : index
    %c0_6 = arith.constant 0 : index
    %11 = vector.load %arg7[%c0_5, %c0_6] : memref<512x128xf32, #tpu.memory_space<vmem>>, vector<512x128xf32>
    tpu.vector_store %arg7[%c0_5, %c0_6], %10 {strides = array<i32>} : memref<512x128xf32, #tpu.memory_space<vmem>>, vector<512x128xf32>,
    %c0_i32_7 = arith.constant 0 : i32
    %12 = arith.cmpi eq, %arg1, %c0_i32_7 : i32
    %13 = arith.extui %12 : i1 to i32
    %c0_i32_8 = arith.constant 0 : i32
    %14 = arith.cmpi ne, %13, %c0_i32_8 : i32
    scf.if %14 {
      %c0_9 = arith.constant 0 : index
      %c0_10 = arith.constant 0 : index
      %15 = vector.load %arg7[%c0_9, %c0_10] : memref<512x128xf32, #tpu.memory_space<vmem>>, vector<512x128xf32>
      %c0_11 = arith.constant 0 : index
      %c0_12 = arith.constant 0 : index
      %16 = vector.load %arg4[%c0_11, %c0_12] : memref<1x128xf32, #tpu.memory_space<vmem>>, vector<1x128xf32>
      %17 = vector.broadcast %16 : vector<1x128xf32> to vector<512x128xf32>
      %18 = arith.addf %15, %17 : vector<512x128xf32>
      %cst_13 = arith.constant 0.000000e+00 : f32
      %19 = vector.broadcast %cst_13 : f32 to vector<512x128xf32>
      %20 = arith.maximumf %18, %19 : vector<512x128xf32>
      %21 = arith.truncf %20 : vector<512x128xf32> to vector<512x128xbf16>
      %c0_14 = arith.constant 0 : index
      %c0_15 = arith.constant 0 : index
      %22 = vector.load %arg5[%c0_14, %c0_15] : memref<128x128xbf16, #tpu.memory_space<vmem>>, vector<128x128xbf16>
      %cst_16 = arith.constant dense<0.000000e+00> : vector<512x128xf32>
      %23 = tpu.matmul %21, %22, %cst_16 {dimension_numbers = #tpu.dot_dimension_numbers<[1], [0], [0], [1], [0, 0, 1, 1], [], []>} : vector<512x128xbf16>, vector<128x128xbf16>, vector<512x128xf32> -> vector<512x128xf32>
      %24 = arith.truncf %23 : vector<512x128xf32> to vector<512x128xbf16>
      %c0_17 = arith.constant 0 : index
      %c0_18 = arith.constant 0 : index
      %25 = vector.load %arg6[%c0_17, %c0_18] : memref<512x128xbf16, #tpu.memory_space<vmem>>, vector<512x128xbf16>
      tpu.vector_store %arg6[%c0_17, %c0_18], %24 {strides = array<i32>} : memref<512x128xbf16, #tpu.memory_space<vmem>>, vector<512x128xbf16>,
    } else {
    }
    return
  }
  func.func @transform_0(%arg0: i32, %arg1: i32) -> (i32, i32) {
    %c0_i32 = arith.constant 0 : i32
    return %arg0, %arg1 : i32, i32
  }
  func.func @transform_1(%arg0: i32, %arg1: i32) -> (i32, i32) {
    %c0_i32 = arith.constant 0 : i32
    %c0_i32_0 = arith.constant 0 : i32
    %c0_i32_1 = arith.constant 0 : i32
    return %c0_i32, %c0_i32_0 : i32, i32
  }
  func.func @transform_2(%arg0: i32, %arg1: i32) -> (i32, i32) {
    %c0_i32 = arith.constant 0 : i32
    %c0_i32_0 = arith.constant 0 : i32
    %c0_i32_1 = arith.constant 0 : i32
    return %c0_i32, %c0_i32_0 : i32, i32
  }
  func.func @transform_3(%arg0: i32, %arg1: i32) -> (i32, i32) {
    %c0_i32 = arith.constant 0 : i32
    %c0_i32_0 = arith.constant 0 : i32
    %c0_i32_1 = arith.constant 0 : i32
    return %c0_i32, %c0_i32_0 : i32, i32
  }
  func.func @transform_4(%arg0: i32, %arg1: i32) -> (i32, i32) {
    %c0_i32 = arith.constant 0 : i32
    %c0_i32_0 = arith.constant 0 : i32
    return %arg0, %c0_i32 : i32, i32
  }
}

</mosaic_0001>

<bundles_post_ra>
// kernel: tpu_custom_call.1
= control target key start
LH: loop header
LB: loop body
LE: loop exit
PB: predicated region body
PF: predicated region fallthrough
CT: control target
= control target key end

     0   :  { %9 = vsyncpa [#allocation4], 0  ;;  %s4229_s0 = inlined_call_operand.hbm [shape: bf16[512,512], index: 0, kind: input, shape index: {}]   ;;  %s4230_s1 = inlined_call_operand.hbm [shape: bf16[512,128], index: 1, kind: input, shape index: {}]   ;;  %s4231_s2 = inlined_call_operand.vmem [shape: f32[1,128], index: 2, kind: input, shape index: {}]   ;;  %s4232_s3 = inlined_call_operand.hbm [shape: bf16[128,128], index: 3, kind: input, shape index: {}]   ;;  %s4233_s4 = inlined_call_operand.hbm [shape: bf16[512,128], index: 4, kind: output, shape index: {}]  }
   0x1   :  { %10 = vsyncpa [#allocation7], 0 }
   0x2   :  { %11 = vsyncpa [#allocation5], 0  ;;  %s3829_s15 = smov [#allocation6]   ;;  %s3735_s19 = scalar_lea.hbm %s4230_s1, 4096 }
   0x3   :  { %s29_s16 = sshll.u32 %s3829_s15, 4  ;;  %p3736_p0 = scmp.ne.s32.totalorder %s4230_s1, %s3735_s19  ;;  %s30_s16 = int_to_ptr.vmem [resolvable:$true] %s29_s16 }
   0x4   :  { %p3739_p1 = scmp.lt.u32.totalorder %s3735_s19, %s4230_s1 }
   0x6   :  { %p3741_p2 = pnand %p3739_p1, %p3736_p0 }
   0x8   :  { %3744 = shalt.err (!%p3741_p2)
}
   0x9   :  { %s3745_s24 = scalar_lea.vmem %s30_s16, 4096  ;;  %p3750_p4 = scmp.lt.s32.totalorder %s30_s16, %s30_s16 }
   0xa   :  { %p3746_p3 = scmp.ne.s32.totalorder %s30_s16, %s3745_s24  ;;  %p3751_p5 = scmp.lt.s32.totalorder %s3745_s24, %s3745_s24 }
   0xc   :  { %p3752_p6 = por %p3751_p5, %p3750_p4 }
   0xe   :  { %p3753_p7 = pnand %p3752_p6, %p3746_p3 }
  0x10   :  { %3756 = shalt.err (!%p3753_p7)
}
  0x11   :  { %s3830_s25 = smov 64   ;;  %s3831_s26 = smov 4  }
  0x12   :  { %35 = dma.hbm_to_vmem [thread:$0]  %s4230_s1, 4096, %s30_s16, [#allocation7], %s3830_s25, %s3830_s25, %s3831_s26  }
  0x13   :  { %s3832_s29 = smov [#allocation3]   ;;  %s3757_s7 = scalar_lea.hbm %s4229_s0, 16384 }
  0x14   :  { %s17_s30 = sshll.u32 %s3832_s29, 4  ;;  %p3758_p8 = scmp.ne.s32.totalorder %s4229_s0, %s3757_s7  ;;  %s18_s30 = int_to_ptr.vmem [resolvable:$true] %s17_s30 }
  0x15   :  { %p3761_p9 = scmp.lt.u32.totalorder %s3757_s7, %s4229_s0 }
  0x17   :  { %p3763_p10 = pnand %p3761_p9, %p3758_p8 }
  0x19   :  { %3766 = shalt.err (!%p3763_p10)
}
  0x1a   :  { %s3767_s12 = scalar_lea.vmem %s18_s30, 16384  ;;  %p3772_p12 = scmp.lt.s32.totalorder %s18_s30, %s18_s30 }
  0x1b   :  { %p3768_p11 = scmp.ne.s32.totalorder %s18_s30, %s3767_s12  ;;  %p3773_p13 = scmp.lt.s32.totalorder %s3767_s12, %s3767_s12 }
  0x1d   :  { %p3774_p0 = por %p3773_p13, %p3772_p12 }
  0x1f   :  { %p3775_p1 = pnand %p3774_p0, %p3768_p11 }
  0x21   :  { %3778 = shalt.err (!%p3775_p1)
}
  0x22   :  { %s3833_s1 = smov 256   ;;  %s3834_s13 = smov 16  }
  0x23   :  { %23 = dma.hbm_to_vmem [thread:$0]  %s4229_s0, 16384, %s18_s30, [#allocation4], %s3833_s1, %s3833_s1, %s3834_s13  }
  0x24   :  { %s3835_s16 = smov [#allocation8]   ;;  %s3779_s20 = scalar_lea.hbm %s4232_s3, 1024 }
  0x25   :  { %s43_s17 = sshll.u32 %s3835_s16, 4  ;;  %p3780_p2 = scmp.ne.s32.totalorder %s4232_s3, %s3779_s20  ;;  %s44_s17 = int_to_ptr.vmem [resolvable:$true] %s43_s17 }
  0x26   :  { %p3783_p3 = scmp.lt.u32.totalorder %s3779_s20, %s4232_s3 }
  0x28   :  { %p3785_p4 = pnand %p3783_p3, %p3780_p2 }
  0x2a   :  { %3788 = shalt.err (!%p3785_p4)
}
  0x2b   :  { %s3789_s27 = scalar_lea.vmem %s44_s17, 1024  ;;  %p3794_p6 = scmp.lt.s32.totalorder %s44_s17, %s44_s17 }
  0x2c   :  { %p3790_p5 = scmp.ne.s32.totalorder %s44_s17, %s3789_s27  ;;  %p3795_p7 = scmp.lt.s32.totalorder %s3789_s27, %s3789_s27 }
  0x2e   :  { %p3796_p8 = por %p3795_p7, %p3794_p6 }
  0x30   :  { %p3797_p9 = pnand %p3796_p8, %p3790_p5 }
  0x32   :  { %3800 = shalt.err (!%p3797_p9)
}
  0x33   :  { %49 = dma.hbm_to_vmem [thread:$0]  %s4232_s3, 1024, %s44_s17, [#allocation7], %s3830_s25, %s3830_s25, %s3831_s26  }
  0x34   :  { %3823 = dma.done.wait [#allocation4], 16384  }
  0x35   :  { %3824 = vsyncadd [#allocation4], 4294950912 }
  0x36   :  { %3825 = dma.done.wait [#allocation7], 5120  }
  0x37   :  { %3826 = vsyncadd [#allocation7], 4294962176  ;;  %v3836_v0 = vmov 0   ;;  %v3503_v1 = vld [vmem:[#allocation6] sm:$0xff]   ;;  %v3504_v2 = vld [vmem:[#allocation6 + $0x8] sm:$0xff]  }
  0x38   :  { %3462 = vmatprep.subr.bf16.mxu1 %v3836_v0  ;;  %1221 = vmatprep.subr.bf16.mxu0 %v3836_v0  ;;  %v3505_v3 = vld [vmem:[#allocation6 + $0x10] sm:$0xff]   ;;  %v3506_v4 = vld [vmem:[#allocation6 + $0x18] sm:$0xff]   ;;  %v3507_v5 = vld [vmem:[#allocation6 + $0x20] sm:$0xff]  }
  0x39   :  { %3478 = vmatpush1.bf16.msra.mxu1 %v3503_v1  ;;  %1222 = vmatpush1.bf16.msra.mxu0 %v3503_v1  ;;  %v3521_v6 = vld [vmem:[#allocation3 + $0x304] ss:$16 sps:$4 sm:$0xff]   ;;  %v3508_v7 = vld [vmem:[#allocation6 + $0x28] sm:$0xff]   ;;  %v3510_v9 = vld [vmem:[#allocation6 + $0x38] sm:$0xff]  }
  0x3a   :  { %3463 = vmatprep.subr.bf16.mxu1 %v3836_v0  ;;  %1223 = vmatprep.subr.bf16.mxu0 %v3836_v0  ;;  %v3509_v8 = vld [vmem:[#allocation6 + $0x30] sm:$0xff]   ;;  %v3511_v10 = vld [vmem:[#allocation6 + $0x40] sm:$0xff]   ;;  %v3512_v11 = vld [vmem:[#allocation6 + $0x48] sm:$0xff]  }
  0x3b   :  { %1445 = vmatprep.mubr.bf16.mxu1 %v3521_v6  ;;  %v3513_v12 = vld [vmem:[#allocation6 + $0x50] sm:$0xff]   ;;  %v3514_v13 = vld [vmem:[#allocation6 + $0x58] sm:$0xff]   ;;  %v3515_v15 = vld [vmem:[#allocation6 + $0x60] sm:$0xff]  }
  0x3c   :  { %v3561_v14 = vld [vmem:[#allocation3 + $0x4] ss:$16 sps:$4 sm:$0xff]   ;;  %v3516_v16 = vld [vmem:[#allocation6 + $0x68] sm:$0xff]   ;;  %v3518_v18 = vld [vmem:[#allocation6 + $0x78] sm:$0xff]  }
  0x3d   :  { %3479 = vmatpush1.bf16.msra.mxu1 %v3504_v2  ;;  %1224 = vmatpush1.bf16.msra.mxu0 %v3504_v2  ;;  %v3517_v17 = vld [vmem:[#allocation6 + $0x70] sm:$0xff]   ;;  %v3522_v20 = vld [vmem:[#allocation6 + $0x80] sm:$0xff]   ;;  %v3523_v24 = vld [vmem:[#allocation6 + $0x88] sm:$0xff]  }
  0x3e   :  { %3464 = vmatprep.subr.bf16.mxu1 %v3836_v0  ;;  %1225 = vmatprep.subr.bf16.mxu0 %v3836_v0  ;;  %v3519_v19 = vld [vmem:[#allocation3 + $0x300] ss:$16 sps:$4 sm:$0xff]   ;;  %v3524_v22 = vld [vmem:[#allocation3 + $0x324] ss:$16 sps:$4 sm:$0xff]   ;;  %v3528_v30 = vld [vmem:[#allocation6 + $0x98] sm:$0xff]  }
  0x3f   :  { %1253 = vmatprep.mubr.bf16.mxu0 %v3561_v14  ;;  %v3559_v21 = vld [vmem:[#allocation3] ss:$16 sps:$4 sm:$0xff]   ;;  %v3565_v23 = vld [vmem:[#allocation3 + $0x24] ss:$16 sps:$4 sm:$0xff]   ;;  %v3533_v36 = vld [vmem:[#allocation6 + $0xa8] sm:$0xff]  }
  0x40   :  { %v3526_v25 = vld [vmem:[#allocation3 + $0x320] ss:$16 sps:$4 sm:$0xff]   ;;  %v3529_v27 = vld [vmem:[#allocation3 + $0x344] ss:$16 sps:$4 sm:$0xff]   ;;  %v3538_v42 = vld [vmem:[#allocation6 + $0xb8] sm:$0xff]  }
  0x41   :  { %3480 = vmatpush1.bf16.msra.mxu1 %v3505_v3  ;;  %1226 = vmatpush1.bf16.msra.mxu0 %v3505_v3  ;;  %v3527_v26 = vld [vmem:[#allocation6 + $0x90] sm:$0xff]   ;;  %v3532_v33 = vld [vmem:[#allocation6 + $0xa0] sm:$0xff]   ;;  %v3543_v48 = vld [vmem:[#allocation6 + $0xc8] sm:$0xff]  }
  0x42   :  { %3465 = vmatprep.subr.bf16.mxu1 %v3836_v0  ;;  %1227 = vmatprep.subr.bf16.mxu0 %v3836_v0  ;;  %v3569_v28 = vld [vmem:[#allocation3 + $0x20] ss:$16 sps:$4 sm:$0xff]   ;;  %v3571_v29 = vld [vmem:[#allocation3 + $0x44] ss:$16 sps:$4 sm:$0xff]   ;;  %v3548_v54 = vld [vmem:[#allocation6 + $0xd8] sm:$0xff]  }
  0x43   :  { %v3531_v31 = vld [vmem:[#allocation3 + $0x340] ss:$16 sps:$4 sm:$0xff]   ;;  %v3534_v34 = vld [vmem:[#allocation3 + $0x364] ss:$16 sps:$4 sm:$0xff]   ;;  %v3553_v60 = vld [vmem:[#allocation6 + $0xe8] sm:$0xff]  }
  0x44   :  { %v3575_v32 = vld [vmem:[#allocation3 + $0x40] ss:$16 sps:$4 sm:$0xff]   ;;  %v3577_v35 = vld [vmem:[#allocation3 + $0x64] ss:$16 sps:$4 sm:$0xff]   ;;  %v3564_v1 = vld [vmem:[#allocation3 + $0xc] ss:$16 sps:$4 sm:$0xff]  }
  0x45   :  { %3481 = vmatpush1.bf16.msra.mxu1 %v3506_v4  ;;  %1228 = vmatpush1.bf16.msra.mxu0 %v3506_v4  ;;  %v3536_v37 = vld [vmem:[#allocation3 + $0x360] ss:$16 sps:$4 sm:$0xff]   ;;  %v3539_v40 = vld [vmem:[#allocation3 + $0x384] ss:$16 sps:$4 sm:$0xff]   ;;  %v3558_v3 = vld [vmem:[#allocation6 + $0xf8] sm:$0xff]  }
  0x46   :  { %3466 = vmatprep.subr.bf16.mxu1 %v3836_v0  ;;  %1229 = vmatprep.subr.bf16.mxu0 %v3836_v0  ;;  %v3581_v38 = vld [vmem:[#allocation3 + $0x60] ss:$16 sps:$4 sm:$0xff]   ;;  %v3583_v41 = vld [vmem:[#allocation3 + $0x84] ss:$16 sps:$4 sm:$0xff]   ;;  %v3562_v4 = vld [vmem:[#allocation3 + $0x8] ss:$16 sps:$4 sm:$0xff]  }
  0x47   :  { %v3537_v39 = vld [vmem:[#allocation6 + $0xb0] sm:$0xff]   ;;  %v3542_v45 = vld [vmem:[#allocation6 + $0xc0] sm:$0xff]   ;;  %v3567_v6 = vld [vmem:[#allocation3 + $0x2c] ss:$16 sps:$4 sm:$0xff]  }
  0x48   :  { %v3541_v43 = vld [vmem:[#allocation3 + $0x380] ss:$16 sps:$4 sm:$0xff]   ;;  %v3544_v46 = vld [vmem:[#allocation3 + $0x3a4] ss:$16 sps:$4 sm:$0xff]  }
  0x49   :  { %3482 = vmatpush1.bf16.msra.mxu1 %v3507_v5  ;;  %1230 = vmatpush1.bf16.msra.mxu0 %v3507_v5  ;;  %v3587_v44 = vld [vmem:[#allocation3 + $0x80] ss:$16 sps:$4 sm:$0xff]   ;;  %v3589_v47 = vld [vmem:[#allocation3 + $0xa4] ss:$16 sps:$4 sm:$0xff]  }
  0x4a   :  { %3467 = vmatprep.subr.bf16.mxu1 %v3836_v0  ;;  %1231 = vmatprep.subr.bf16.mxu0 %v3836_v0  ;;  %v3546_v49 = vld [vmem:[#allocation3 + $0x3a0] ss:$16 sps:$4 sm:$0xff]   ;;  %v3549_v52 = vld [vmem:[#allocation3 + $0x3c4] ss:$16 sps:$4 sm:$0xff]  }
  0x4b   :  { %v3593_v50 = vld [vmem:[#allocation3 + $0xa0] ss:$16 sps:$4 sm:$0xff]   ;;  %v3595_v53 = vld [vmem:[#allocation3 + $0xc4] ss:$16 sps:$4 sm:$0xff]  }
  0x4c   :  { %v3547_v51 = vld [vmem:[#allocation6 + $0xd0] sm:$0xff]   ;;  %v3552_v57 = vld [vmem:[#allocation6 + $0xe0] sm:$0xff]  }
  0x4d   :  { %3483 = vmatpush1.bf16.msra.mxu1 %v3508_v7  ;;  %1232 = vmatpush1.bf16.msra.mxu0 %v3508_v7  ;;  %v3551_v55 = vld [vmem:[#allocation3 + $0x3c0] ss:$16 sps:$4 sm:$0xff]   ;;  %v3554_v58 = vld [vmem:[#allocation3 + $0x3e4] ss:$16 sps:$4 sm:$0xff]  }
  0x4e   :  { %3468 = vmatprep.subr.bf16.mxu1 %v3836_v0  ;;  %1233 = vmatprep.subr.bf16.mxu0 %v3836_v0  ;;  %v3599_v56 = vld [vmem:[#allocation3 + $0xc0] ss:$16 sps:$4 sm:$0xff]   ;;  %v3601_v59 = vld [vmem:[#allocation3 + $0xe4] ss:$16 sps:$4 sm:$0xff]  }
  0x4f   :  { %v3556_v61 = vld [vmem:[#allocation3 + $0x3e0] ss:$16 sps:$4 sm:$0xff]   ;;  %v3607_v2 = vld [vmem:[#allocation3 + $0x104] ss:$16 sps:$4 sm:$0xff]  }
  0x50   :  { %v3605_v62 = vld [vmem:[#allocation3 + $0xe0] ss:$16 sps:$4 sm:$0xff]   ;;  %v3613_v7 = vld [vmem:[#allocation3 + $0x124] ss:$16 sps:$4 sm:$0xff]  }
  0x51   :  { %3484 = vmatpush1.bf16.msra.mxu1 %v3509_v8  ;;  %1234 = vmatpush1.bf16.msra.mxu0 %v3509_v8  ;;  %v3557_v63 = vld [vmem:[#allocation6 + $0xf0] sm:$0xff]   ;;  %v3570_v8 = vld [vmem:[#allocation3 + $0x28] ss:$16 sps:$4 sm:$0xff]  }
  0x52   :  { %3469 = vmatprep.subr.bf16.mxu1 %v3836_v0  ;;  %1235 = vmatprep.subr.bf16.mxu0 %v3836_v0  ;;  %v3611_v5 = vld [vmem:[#allocation3 + $0x100] ss:$16 sps:$4 sm:$0xff]   ;;  %v3625_v14 = vld [vmem:[#allocation3 + $0x164] ss:$16 sps:$4 sm:$0xff]  }
  0x55   :  { %3485 = vmatpush1.bf16.msra.mxu1 %v3510_v9  ;;  %1236 = vmatpush1.bf16.msra.mxu0 %v3510_v9  ;;  %v3617_v9 = vld [vmem:[#allocation3 + $0x120] ss:$16 sps:$4 sm:$0xff]  }
  0x56   :  { %3470 = vmatprep.subr.bf16.mxu1 %v3836_v0  ;;  %1237 = vmatprep.subr.bf16.mxu0 %v3836_v0 }
  0x59   :  { %3486 = vmatpush1.bf16.msra.mxu1 %v3511_v10  ;;  %1238 = vmatpush1.bf16.msra.mxu0 %v3511_v10  ;;  %v3573_v10 = vld [vmem:[#allocation3 + $0x4c] ss:$16 sps:$4 sm:$0xff]  }
  0x5a   :  { %3471 = vmatprep.subr.bf16.mxu1 %v3836_v0  ;;  %1239 = vmatprep.subr.bf16.mxu0 %v3836_v0 }
  0x5d   :  { %3487 = vmatpush1.bf16.msra.mxu1 %v3512_v11  ;;  %1240 = vmatpush1.bf16.msra.mxu0 %v3512_v11  ;;  %v3619_v11 = vld [vmem:[#allocation3 + $0x144] ss:$16 sps:$4 sm:$0xff]  }
  0x5e   :  { %3472 = vmatprep.subr.bf16.mxu1 %v3836_v0  ;;  %1241 = vmatprep.subr.bf16.mxu0 %v3836_v0 }
  0x61   :  { %3488 = vmatpush1.bf16.msra.mxu1 %v3513_v12  ;;  %1242 = vmatpush1.bf16.msra.mxu0 %v3513_v12  ;;  %v3576_v12 = vld [vmem:[#allocation3 + $0x48] ss:$16 sps:$4 sm:$0xff]  }
  0x62   :  { %3473 = vmatprep.subr.bf16.mxu1 %v3836_v0  ;;  %1243 = vmatprep.subr.bf16.mxu0 %v3836_v0 }
  0x65   :  { %3489 = vmatpush1.bf16.msra.mxu1 %v3514_v13  ;;  %1244 = vmatpush1.bf16.msra.mxu0 %v3514_v13  ;;  %v3579_v13 = vld [vmem:[#allocation3 + $0x6c] ss:$16 sps:$4 sm:$0xff]  }
  0x66   :  { %3474 = vmatprep.subr.bf16.mxu1 %v3836_v0  ;;  %1245 = vmatprep.subr.bf16.mxu0 %v3836_v0 }
  0x69   :  { %3490 = vmatpush1.bf16.msra.mxu1 %v3515_v15  ;;  %1246 = vmatpush1.bf16.msra.mxu0 %v3515_v15  ;;  %v3582_v15 = vld [vmem:[#allocation3 + $0x68] ss:$16 sps:$4 sm:$0xff]  }
  0x6a   :  { %3475 = vmatprep.subr.bf16.mxu1 %v3836_v0  ;;  %1247 = vmatprep.subr.bf16.mxu0 %v3836_v0 }
  0x6d   :  { %3491 = vmatpush1.bf16.msra.mxu1 %v3516_v16  ;;  %1248 = vmatpush1.bf16.msra.mxu0 %v3516_v16  ;;  %v3629_v16 = vld [vmem:[#allocation3 + $0x160] ss:$16 sps:$4 sm:$0xff]  }
  0x6e   :  { %3476 = vmatprep.subr.bf16.mxu1 %v3836_v0  ;;  %1249 = vmatprep.subr.bf16.mxu0 %v3836_v0 }
  0x71   :  { %3492 = vmatpush1.bf16.msra.mxu1 %v3517_v17  ;;  %1250 = vmatpush1.bf16.msra.mxu0 %v3517_v17  ;;  %v3585_v17 = vld [vmem:[#allocation3 + $0x8c] ss:$16 sps:$4 sm:$0xff]  }
  0x72   :  { %3477 = vmatprep.subr.bf16.mxu1 %v3836_v0  ;;  %1251 = vmatprep.subr.bf16.mxu0 %v3836_v0 }
  0x75   :  { %3493 = vmatpush1.bf16.msra.mxu1 %v3518_v18  ;;  %1252 = vmatpush1.bf16.msra.mxu0 %v3518_v18  ;;  %v3631_v18 = vld [vmem:[#allocation3 + $0x184] ss:$16 sps:$4 sm:$0xff]  }
  0x76   :  { %1510 = vmatprep.subr.bf16.mxu1 %v3836_v0 }
  0x78   :  { %1446 = vmatmul.mubr.bf16.vlgmr.msra.gmra.mrb[0].mxu1 %v3519_v19  ;;  %1254 = vmatmul.mubr.bf16.vlgmr.msra.gmra.mrb[0].mxu0 %v3559_v21  ;;  %v3588_v19 = vld [vmem:[#allocation3 + $0x88] ss:$16 sps:$4 sm:$0xff]   ;;  %v3591_v21 = vld [vmem:[#allocation3 + $0xac] ss:$16 sps:$4 sm:$0xff]  }
  0x79   :  { %1511 = vmatpush1.bf16.msra.mxu1 %v3522_v20  ;;  %1453 = vmatprep.mubr.bf16.mxu1 %v3524_v22  ;;  %v3635_v20 = vld [vmem:[#allocation3 + $0x180] ss:$16 sps:$4 sm:$0xff]   ;;  %v3637_v22 = vld [vmem:[#allocation3 + $0x1a4] ss:$16 sps:$4 sm:$0xff]  }
  0x7a   :  { %1512 = vmatprep.subr.bf16.mxu1 %v3836_v0  ;;  %1261 = vmatprep.mubr.bf16.mxu0 %v3565_v23  ;;  %v3679_v23 = vld [vmem:[#allocation8] sm:$0xff]  }
  0x7b   :  { %3382 = vmatprep.subr.bf16.mxu0 %v3679_v23 }
  0x7c   :  { %3383 = vmatpush3.bf16.msra.mxu0 %v3679_v23 }
  0x7d   :  { %1513 = vmatpush1.bf16.msra.mxu1 %v3523_v24  ;;  %v3594_v24 = vld [vmem:[#allocation3 + $0xa8] ss:$16 sps:$4 sm:$0xff]  }
  0x7e   :  { %1514 = vmatprep.subr.bf16.mxu1 %v3836_v0 }
  0x80   :  { %1454 = vmatmul.mubr.bf16.gmra.mrb[4].mxu1 %v3526_v25  ;;  %1262 = vmatmul.mubr.bf16.gmra.mrb[4].mxu0 %v3569_v28  ;;  %v3641_v25 = vld [vmem:[#allocation3 + $0x1a0] ss:$16 sps:$4 sm:$0xff]   ;;  %v3600_v28 = vld [vmem:[#allocation3 + $0xc8] ss:$16 sps:$4 sm:$0xff]  }
  0x81   :  { %1515 = vmatpush1.bf16.msra.mxu1 %v3527_v26  ;;  %1461 = vmatprep.mubr.bf16.mxu1 %v3529_v27  ;;  %v3597_v26 = vld [vmem:[#allocation3 + $0xcc] ss:$16 sps:$4 sm:$0xff]   ;;  %v3643_v27 = vld [vmem:[#allocation3 + $0x1c4] ss:$16 sps:$4 sm:$0xff]  }
  0x82   :  { %1516 = vmatprep.subr.bf16.mxu1 %v3836_v0  ;;  %1269 = vmatprep.mubr.bf16.mxu0 %v3571_v29  ;;  %v3647_v29 = vld [vmem:[#allocation3 + $0x1c0] ss:$16 sps:$4 sm:$0xff]  }
  0x85   :  { %1517 = vmatpush1.bf16.msra.mxu1 %v3528_v30  ;;  %v3603_v30 = vld [vmem:[#allocation3 + $0xec] ss:$16 sps:$4 sm:$0xff]  }
  0x86   :  { %1518 = vmatprep.subr.bf16.mxu1 %v3836_v0 }
  0x88   :  { %1462 = vmatmul.mubr.bf16.gmra.mrb[8].mxu1 %v3531_v31  ;;  %1270 = vmatmul.mubr.bf16.gmra.mrb[8].mxu0 %v3575_v32  ;;  %v3649_v31 = vld [vmem:[#allocation3 + $0x1e4] ss:$16 sps:$4 sm:$0xff]   ;;  %v3606_v32 = vld [vmem:[#allocation3 + $0xe8] ss:$16 sps:$4 sm:$0xff]  }
  0x89   :  { %1519 = vmatpush1.bf16.msra.mxu1 %v3532_v33  ;;  %1469 = vmatprep.mubr.bf16.mxu1 %v3534_v34  ;;  %v3653_v33 = vld [vmem:[#allocation3 + $0x1e0] ss:$16 sps:$4 sm:$0xff]   ;;  %v3609_v34 = vld [vmem:[#allocation3 + $0x10c] ss:$16 sps:$4 sm:$0xff]  }
  0x8a   :  { %1520 = vmatprep.subr.bf16.mxu1 %v3836_v0  ;;  %1277 = vmatprep.mubr.bf16.mxu0 %v3577_v35  ;;  %v3655_v35 = vld [vmem:[#allocation3 + $0x204] ss:$16 sps:$4 sm:$0xff]  }
  0x8d   :  { %1521 = vmatpush1.bf16.msra.mxu1 %v3533_v36  ;;  %v3698_v36 = vld [vmem:[#allocation8 + $0x8] sm:$0xff]  }
  0x8e   :  { %1522 = vmatprep.subr.bf16.mxu1 %v3836_v0  ;;  %3384 = vmatprep.subr.bf16.mxu0 %v3698_v36 }
  0x8f   :  { %3385 = vmatpush3.bf16.msra.mxu0 %v3698_v36 }
  0x90   :  { %1470 = vmatmul.mubr.bf16.gmra.mrb[12].mxu1 %v3536_v37  ;;  %1278 = vmatmul.mubr.bf16.gmra.mrb[12].mxu0 %v3581_v38  ;;  %v3612_v37 = vld [vmem:[#allocation3 + $0x108] ss:$16 sps:$4 sm:$0xff]   ;;  %v3659_v38 = vld [vmem:[#allocation3 + $0x200] ss:$16 sps:$4 sm:$0xff]  }
  0x91   :  { %1523 = vmatpush1.bf16.msra.mxu1 %v3537_v39  ;;  %1477 = vmatprep.mubr.bf16.mxu1 %v3539_v40  ;;  %v3615_v39 = vld [vmem:[#allocation3 + $0x12c] ss:$16 sps:$4 sm:$0xff]   ;;  %v3661_v40 = vld [vmem:[#allocation3 + $0x224] ss:$16 sps:$4 sm:$0xff]  }
  0x92   :  { %1524 = vmatprep.subr.bf16.mxu1 %v3836_v0  ;;  %1285 = vmatprep.mubr.bf16.mxu0 %v3583_v41  ;;  %v3618_v41 = vld [vmem:[#allocation3 + $0x128] ss:$16 sps:$4 sm:$0xff]  }
  0x95   :  { %1525 = vmatpush1.bf16.msra.mxu1 %v3538_v42  ;;  %v3665_v42 = vld [vmem:[#allocation3 + $0x220] ss:$16 sps:$4 sm:$0xff]  }
  0x96   :  { %1526 = vmatprep.subr.bf16.mxu1 %v3836_v0 }
  0x98   :  { %1478 = vmatmul.mubr.bf16.gmra.mrb[16].mxu1 %v3541_v43  ;;  %1286 = vmatmul.mubr.bf16.gmra.mrb[16].mxu0 %v3587_v44  ;;  %v3621_v43 = vld [vmem:[#allocation3 + $0x14c] ss:$16 sps:$4 sm:$0xff]   ;;  %v3667_v44 = vld [vmem:[#allocation3 + $0x244] ss:$16 sps:$4 sm:$0xff]  }
  0x99   :  { %1527 = vmatpush1.bf16.msra.mxu1 %v3542_v45  ;;  %1485 = vmatprep.mubr.bf16.mxu1 %v3544_v46  ;;  %v3624_v45 = vld [vmem:[#allocation3 + $0x148] ss:$16 sps:$4 sm:$0xff]   ;;  %v3671_v46 = vld [vmem:[#allocation3 + $0x240] ss:$16 sps:$4 sm:$0xff]  }
  0x9a   :  { %1528 = vmatprep.subr.bf16.mxu1 %v3836_v0  ;;  %1293 = vmatprep.mubr.bf16.mxu0 %v3589_v47  ;;  %v3711_v47 = vld [vmem:[#allocation8 + $0x10] sm:$0xff]  }
  0x9b   :  { %3386 = vmatprep.subr.bf16.mxu0 %v3711_v47 }
  0x9c   :  { %3387 = vmatpush3.bf16.msra.mxu0 %v3711_v47 }
  0x9d   :  { %1529 = vmatpush1.bf16.msra.mxu1 %v3543_v48  ;;  %v3627_v48 = vld [vmem:[#allocation3 + $0x16c] ss:$16 sps:$4 sm:$0xff]  }
  0x9e   :  { %1530 = vmatprep.subr.bf16.mxu1 %v3836_v0 }
  0xa0   :  { %1486 = vmatmul.mubr.bf16.gmra.mrb[20].mxu1 %v3546_v49  ;;  %1294 = vmatmul.mubr.bf16.gmra.mrb[20].mxu0 %v3593_v50  ;;  %v3673_v49 = vld [vmem:[#allocation3 + $0x264] ss:$16 sps:$4 sm:$0xff]   ;;  %v3715_v50 = vld [vmem:[#allocation8 + $0x18] sm:$0xff]  }
  0xa1   :  { %1531 = vmatpush1.bf16.msra.mxu1 %v3547_v51  ;;  %1493 = vmatprep.mubr.bf16.mxu1 %v3549_v52  ;;  %v3630_v51 = vld [vmem:[#allocation3 + $0x168] ss:$16 sps:$4 sm:$0xff]   ;;  %v3677_v52 = vld [vmem:[#allocation3 + $0x260] ss:$16 sps:$4 sm:$0xff]  }
  0xa2   :  { %1532 = vmatprep.subr.bf16.mxu1 %v3836_v0  ;;  %1301 = vmatprep.mubr.bf16.mxu0 %v3595_v53  ;;  %v3716_v53 = vld [vmem:[#allocation8 + $0x20] sm:$0xff]  }
  0xa3   :  { %3388 = vmatprep.subr.bf16.mxu0 %v3715_v50 }
  0xa4   :  { %3389 = vmatpush3.bf16.msra.mxu0 %v3715_v50 }
  0xa5   :  { %1533 = vmatpush1.bf16.msra.mxu1 %v3548_v54  ;;  %v3633_v54 = vld [vmem:[#allocation3 + $0x18c] ss:$16 sps:$4 sm:$0xff]   ;;  %3390 = vmatprep.subr.bf16.mxu0 %v3716_v53 }
  0xa6   :  { %1534 = vmatprep.subr.bf16.mxu1 %v3836_v0 }
  0xa8   :  { %1494 = vmatmul.mubr.bf16.gmra.mrb[24].mxu1 %v3551_v55  ;;  %1302 = vmatmul.mubr.bf16.gmra.mrb[24].mxu0 %v3599_v56  ;;  %v3680_v55 = vld [vmem:[#allocation3 + $0x284] ss:$16 sps:$4 sm:$0xff]   ;;  %v3720_v56 = vld [vmem:[#allocation8 + $0x28] sm:$0xff]  }
  0xa9   :  { %1535 = vmatpush1.bf16.msra.mxu1 %v3552_v57  ;;  %1501 = vmatprep.mubr.bf16.mxu1 %v3554_v58  ;;  %v3636_v57 = vld [vmem:[#allocation3 + $0x188] ss:$16 sps:$4 sm:$0xff]   ;;  %v3684_v58 = vld [vmem:[#allocation3 + $0x280] ss:$16 sps:$4 sm:$0xff]  }
  0xaa   :  { %1536 = vmatprep.subr.bf16.mxu1 %v3836_v0  ;;  %1309 = vmatprep.mubr.bf16.mxu0 %v3601_v59  ;;  %v3721_v59 = vld [vmem:[#allocation8 + $0x30] sm:$0xff]  }
  0xab   :  { %3391 = vmatpush3.bf16.msra.mxu0 %v3716_v53 }
  0xac   :  { %3392 = vmatprep.subr.bf16.mxu0 %v3720_v56 }
  0xad   :  { %1537 = vmatpush1.bf16.msra.mxu1 %v3553_v60  ;;  %v3639_v60 = vld [vmem:[#allocation3 + $0x1ac] ss:$16 sps:$4 sm:$0xff]  }
  0xae   :  { %1538 = vmatprep.subr.bf16.mxu1 %v3836_v0 }
  0xaf   :  { %3393 = vmatpush3.bf16.msra.mxu0 %v3720_v56 }
  0xb0   :  { %1502 = vmatmul.mubr.bf16.gmra.mrb[28].mxu1 %v3556_v61  ;;  %1310 = vmatmul.mubr.bf16.gmra.mrb[28].mxu0 %v3605_v62  ;;  %v3686_v61 = vld [vmem:[#allocation3 + $0x2a4] ss:$16 sps:$4 sm:$0xff]   ;;  %v3725_v62 = vld [vmem:[#allocation8 + $0x38] sm:$0xff]  }
  0xb1   :  { %1539 = vmatpush1.bf16.msra.mxu1 %v3557_v63  ;;  %1542 = vmatprep.mubr.bf16.mxu1 %v3564_v1  ;;  %v3642_v63 = vld [vmem:[#allocation3 + $0x1a8] ss:$16 sps:$4 sm:$0xff]   ;;  %v3690_v1 = vld [vmem:[#allocation3 + $0x2a0] ss:$16 sps:$4 sm:$0xff]  }
  0xb2   :  { %1540 = vmatprep.subr.bf16.mxu1 %v3836_v0  ;;  %1317 = vmatprep.mubr.bf16.mxu0 %v3607_v2  ;;  %v3623_v0 = vld [vmem:[#allocation3 + $0x140] ss:$16 sps:$4 sm:$0xff]   ;;  %v3645_v2 = vld [vmem:[#allocation3 + $0x1cc] ss:$16 sps:$4 sm:$0xff]  }
  0xb3   :  { %3394 = vmatprep.subr.bf16.mxu0 %v3721_v59 }
  0xb4   :  { %3395 = vmatpush3.bf16.msra.mxu0 %v3721_v59  ;;  %v3704_v59 = vld [vmem:[#allocation3 + $0x2e8] ss:$16 sps:$4 sm:$0xff]  }
  0xb5   :  { %1541 = vmatpush1.bf16.msra.mxu1 %v3558_v3  ;;  %3396 = vmatprep.subr.bf16.mxu0 %v3725_v62  ;;  %v3692_v3 = vld [vmem:[#allocation3 + $0x2c4] ss:$16 sps:$4 sm:$0xff]  }
  0xb8   :  { %1543 = vmatmul.mubr.bf16.vlgmr.msra.gmra.mrb[32].mxu1 %v3562_v4  ;;  %1318 = vmatmul.mubr.bf16.gmra.mrb[32].mxu0 %v3611_v5  ;;  %v3648_v4 = vld [vmem:[#allocation3 + $0x1c8] ss:$16 sps:$4 sm:$0xff]   ;;  %v3696_v5 = vld [vmem:[#allocation3 + $0x2c0] ss:$16 sps:$4 sm:$0xff]  }
  0xb9   :  { %1550 = vmatprep.mubr.bf16.mxu1 %v3567_v6  ;;  %1325 = vmatprep.mubr.bf16.mxu0 %v3613_v7  ;;  %v3651_v6 = vld [vmem:[#allocation3 + $0x1ec] ss:$16 sps:$4 sm:$0xff]   ;;  %v3699_v7 = vld [vmem:[#allocation3 + $0x2e4] ss:$16 sps:$4 sm:$0xff]  }
  0xba   :  { %3397 = vmatpush3.bf16.msra.mxu0 %v3725_v62  ;;  %v3705_v62 = vld [vmem:[#allocation3 + $0x30c] ss:$16 sps:$4 sm:$0xff]  }
  0xc0   :  { %1551 = vmatmul.mubr.bf16.gmra.mrb[36].mxu1 %v3570_v8  ;;  %1326 = vmatmul.mubr.bf16.gmra.mrb[36].mxu0 %v3617_v9  ;;  %v3654_v8 = vld [vmem:[#allocation3 + $0x1e8] ss:$16 sps:$4 sm:$0xff]   ;;  %v3703_v9 = vld [vmem:[#allocation3 + $0x2e0] ss:$16 sps:$4 sm:$0xff]  }
  0xc1   :  { %1558 = vmatprep.mubr.bf16.mxu1 %v3573_v10  ;;  %1333 = vmatprep.mubr.bf16.mxu0 %v3619_v11  ;;  %v3657_v10 = vld [vmem:[#allocation3 + $0x20c] ss:$16 sps:$4 sm:$0xff]   ;;  %v3660_v11 = vld [vmem:[#allocation3 + $0x208] ss:$16 sps:$4 sm:$0xff]  }
  0xc8   :  { %1559 = vmatmul.mubr.bf16.gmra.mrb[40].mxu1 %v3576_v12  ;;  %1334 = vmatmul.mubr.bf16.gmra.mrb[40].mxu0 %v3623_v0  ;;  %v3663_v12 = vld [vmem:[#allocation3 + $0x22c] ss:$16 sps:$4 sm:$0xff]   ;;  %v3666_v0 = vld [vmem:[#allocation3 + $0x228] ss:$16 sps:$4 sm:$0xff]  }
  0xc9   :  { %1566 = vmatprep.mubr.bf16.mxu1 %v3579_v13  ;;  %1341 = vmatprep.mubr.bf16.mxu0 %v3625_v14  ;;  %v3669_v13 = vld [vmem:[#allocation3 + $0x24c] ss:$16 sps:$4 sm:$0xff]   ;;  %v3672_v14 = vld [vmem:[#allocation3 + $0x248] ss:$16 sps:$4 sm:$0xff]  }
  0xd0   :  { %1567 = vmatmul.mubr.bf16.gmra.mrb[44].mxu1 %v3582_v15  ;;  %1342 = vmatmul.mubr.bf16.gmra.mrb[44].mxu0 %v3629_v16  ;;  %v3675_v15 = vld [vmem:[#allocation3 + $0x26c] ss:$16 sps:$4 sm:$0xff]  }
  0xd1   :  { %1574 = vmatprep.mubr.bf16.mxu1 %v3585_v17  ;;  %1349 = vmatprep.mubr.bf16.mxu0 %v3631_v18 }
  0xd8   :  { %1575 = vmatmul.mubr.bf16.gmra.mrb[48].mxu1 %v3588_v19  ;;  %1350 = vmatmul.mubr.bf16.gmra.mrb[48].mxu0 %v3635_v20  ;;  %v3678_v19 = vld [vmem:[#allocation3 + $0x268] ss:$16 sps:$4 sm:$0xff]  }
  0xd9   :  { %1582 = vmatprep.mubr.bf16.mxu1 %v3591_v21  ;;  %1357 = vmatprep.mubr.bf16.mxu0 %v3637_v22  ;;  %v3682_v22 = vld [vmem:[#allocation3 + $0x28c] ss:$16 sps:$4 sm:$0xff]  }
  0xe0   :  { %1583 = vmatmul.mubr.bf16.gmra.mrb[52].mxu1 %v3594_v24  ;;  %1358 = vmatmul.mubr.bf16.gmra.mrb[52].mxu0 %v3641_v25 }
  0xe1   :  { %1590 = vmatprep.mubr.bf16.mxu1 %v3597_v26  ;;  %1365 = vmatprep.mubr.bf16.mxu0 %v3643_v27 }
  0xe8   :  { %1591 = vmatmul.mubr.bf16.gmra.mrb[56].mxu1 %v3600_v28  ;;  %1366 = vmatmul.mubr.bf16.gmra.mrb[56].mxu0 %v3647_v29  ;;  %v3685_v29 = vld [vmem:[#allocation3 + $0x288] ss:$16 sps:$4 sm:$0xff]  }
  0xe9   :  { %1598 = vmatprep.mubr.bf16.mxu1 %v3603_v30  ;;  %1373 = vmatprep.mubr.bf16.mxu0 %v3649_v31 }
  0xf0   :  { %1599 = vmatmul.mubr.bf16.gmra.mrb[60].mxu1 %v3606_v32  ;;  %1374 = vmatmul.mubr.bf16.gmra.mrb[60].mxu0 %v3653_v33  ;;  %v3688_v32 = vld [vmem:[#allocation3 + $0x2ac] ss:$16 sps:$4 sm:$0xff]  }
  0xf1   :  { %1606 = vmatprep.mubr.bf16.mxu1 %v3609_v34  ;;  %1381 = vmatprep.mubr.bf16.mxu0 %v3655_v35 }
  0xf8   :  { %1607 = vmatmul.mubr.bf16.gmra.mrb[64].mxu1 %v3612_v37  ;;  %1382 = vmatmul.mubr.bf16.gmra.mrb[64].mxu0 %v3659_v38 }
  0xf9   :  { %1614 = vmatprep.mubr.bf16.mxu1 %v3615_v39  ;;  %1389 = vmatprep.mubr.bf16.mxu0 %v3661_v40  ;;  %v3691_v39 = vld [vmem:[#allocation3 + $0x2a8] ss:$16 sps:$4 sm:$0xff]  }
 0x100   :  { %1615 = vmatmul.mubr.bf16.gmra.mrb[68].mxu1 %v3618_v41  ;;  %1390 = vmatmul.mubr.bf16.gmra.mrb[68].mxu0 %v3665_v42  ;;  %v3694_v42 = vld [vmem:[#allocation3 + $0x2cc] ss:$16 sps:$4 sm:$0xff]  }
 0x101   :  { %1622 = vmatprep.mubr.bf16.mxu1 %v3621_v43  ;;  %1397 = vmatprep.mubr.bf16.mxu0 %v3667_v44 }
 0x108   :  { %1623 = vmatmul.mubr.bf16.gmra.mrb[72].mxu1 %v3624_v45  ;;  %1398 = vmatmul.mubr.bf16.gmra.mrb[72].mxu0 %v3671_v46 }
 0x109   :  { %1630 = vmatprep.mubr.bf16.mxu1 %v3627_v48  ;;  %1405 = vmatprep.mubr.bf16.mxu0 %v3673_v49  ;;  %v3697_v49 = vld [vmem:[#allocation3 + $0x2c8] ss:$16 sps:$4 sm:$0xff]  }
 0x110   :  { %1631 = vmatmul.mubr.bf16.gmra.mrb[76].mxu1 %v3630_v51  ;;  %1406 = vmatmul.mubr.bf16.gmra.mrb[76].mxu0 %v3677_v52  ;;  %v3701_v52 = vld [vmem:[#allocation3 + $0x2ec] ss:$16 sps:$4 sm:$0xff]  }
 0x111   :  { %1638 = vmatprep.mubr.bf16.mxu1 %v3633_v54  ;;  %1413 = vmatprep.mubr.bf16.mxu0 %v3680_v55 }
 0x118   :  { %1639 = vmatmul.mubr.bf16.gmra.mrb[80].mxu1 %v3636_v57  ;;  %1414 = vmatmul.mubr.bf16.gmra.mrb[80].mxu0 %v3684_v58 }
 0x119   :  { %1646 = vmatprep.mubr.bf16.mxu1 %v3639_v60  ;;  %1421 = vmatprep.mubr.bf16.mxu0 %v3686_v61 }
 0x120   :  { %1647 = vmatmul.mubr.bf16.gmra.mrb[84].mxu1 %v3642_v63  ;;  %1422 = vmatmul.mubr.bf16.gmra.mrb[84].mxu0 %v3690_v1 }
 0x121   :  { %1654 = vmatprep.mubr.bf16.mxu1 %v3645_v2  ;;  %1429 = vmatprep.mubr.bf16.mxu0 %v3692_v3 }
 0x128   :  { %1655 = vmatmul.mubr.bf16.gmra.mrb[88].mxu1 %v3648_v4  ;;  %1430 = vmatmul.mubr.bf16.gmra.mrb[88].mxu0 %v3696_v5 }
 0x129   :  { %1662 = vmatprep.mubr.bf16.mxu1 %v3651_v6  ;;  %1437 = vmatprep.mubr.bf16.mxu0 %v3699_v7  ;;  %v3707_v6 = vld [vmem:[#allocation3 + $0x308] ss:$16 sps:$4 sm:$0xff]  }
 0x130   :  { %1663 = vmatmul.mubr.bf16.gmra.mrb[92].mxu1 %v3654_v8  ;;  %1438 = vmatmul.mubr.bf16.gmra.mrb[92].mxu0 %v3703_v9  ;;  %v3708_v9 = vld [vmem:[#allocation3 + $0x32c] ss:$16 sps:$4 sm:$0xff]  }
 0x131   :  { %1670 = vmatprep.mubr.bf16.mxu1 %v3657_v10 }
 0x138   :  { %1671 = vmatmul.mubr.bf16.gmra.mrb[96].mxu1 %v3660_v11 }
 0x139   :  { %1678 = vmatprep.mubr.bf16.mxu1 %v3663_v12 }
 0x140   :  { %1679 = vmatmul.mubr.bf16.gmra.mrb[100].mxu1 %v3666_v0 }
 0x141   :  { %1686 = vmatprep.mubr.bf16.mxu1 %v3669_v13 }
 0x148   :  { %1687 = vmatmul.mubr.bf16.gmra.mrb[104].mxu1 %v3672_v14 }
 0x149   :  { %1694 = vmatprep.mubr.bf16.mxu1 %v3675_v15  ;;  %v3710_v15 = vld [vmem:[#allocation3 + $0x328] ss:$16 sps:$4 sm:$0xff]  }
 0x14b   :  { %v3953_v16 = vpop.f32.mrb[0].mxu1  ;;  %v3955_v17 = vpop.f32.mrb[0].mxu0 }
 0x14c   :  { %v1449_v18 = vpop.f32.mrb[1].mxu1  ;;  %v1257_v20 = vpop.f32.mrb[1].mxu0 }
 0x14d   :  { %v3957_v21 = vpop.f32.mrb[2].mxu1  ;;  %v3959_v23 = vpop.f32.mrb[2].mxu0  ;;  %v3712_v20 = vld [vmem:[#allocation3 + $0x34c] ss:$16 sps:$4 sm:$0xff]  }
 0x14e   :  { %v1452_v24 = vpop.f32.mrb[3].mxu1  ;;  %v1260_v25 = vpop.f32.mrb[3].mxu0 }
 0x150   :  { %1695 = vmatmul.mubr.bf16.gmra.mrb[108].mxu1 %v3678_v19 }
 0x151   :  { %1702 = vmatprep.mubr.bf16.mxu1 %v3682_v22 }
 0x153   :  { %v3961_v26 = vpop.f32.mrb[4].mxu1  ;;  %v3963_v27 = vpop.f32.mrb[4].mxu0 }
 0x154   :  { %v1457_v28 = vpop.f32.mrb[5].mxu1  ;;  %v1265_v30 = vpop.f32.mrb[5].mxu0 }
 0x155   :  { %v3965_v31 = vpop.f32.mrb[6].mxu1  ;;  %v3967_v33 = vpop.f32.mrb[6].mxu0 }
 0x156   :  { %v1460_v34 = vpop.f32.mrb[7].mxu1  ;;  %v1268_v35 = vpop.f32.mrb[7].mxu0 }
 0x158   :  { %1703 = vmatmul.mubr.bf16.gmra.mrb[112].mxu1 %v3685_v29 }
 0x159   :  { %1710 = vmatprep.mubr.bf16.mxu1 %v3688_v32  ;;  %v3714_v32 = vld [vmem:[#allocation3 + $0x348] ss:$16 sps:$4 sm:$0xff]  }
 0x15b   :  { %v3969_v36 = vpop.f32.mrb[8].mxu1  ;;  %v3971_v37 = vpop.f32.mrb[8].mxu0 }
 0x15c   :  { %v1465_v38 = vpop.f32.mrb[9].mxu1  ;;  %v1273_v40 = vpop.f32.mrb[9].mxu0 }
 0x15d   :  { %v3973_v41 = vpop.f32.mrb[10].mxu1  ;;  %v3975_v43 = vpop.f32.mrb[10].mxu0  ;;  %v3717_v38 = vld [vmem:[#allocation3 + $0x36c] ss:$16 sps:$4 sm:$0xff]  }
 0x15e   :  { %v1468_v44 = vpop.f32.mrb[11].mxu1  ;;  %v1276_v45 = vpop.f32.mrb[11].mxu0 }
 0x15f   :  { %v4020_v45 = vld [vmem:[%s4231_s2] ss:$0 sm:$0xff]  ;;  %s3837_s2 = smov [#allocation9]  }
 0x160   :  { %1711 = vmatmul.mubr.bf16.gmra.mrb[116].mxu1 %v3691_v39  ;;  %s2839_s30 = sshll.u32 %s3837_s2, 4  ;;  %s2840_s30 = int_to_ptr.vmem [resolvable:$true] %s2839_s30 }
 0x161   :  { %1718 = vmatprep.mubr.bf16.mxu1 %v3694_v42  ;;  %s3801_s5 = scalar_lea.vmem %s2840_s30, 4096  ;;  %p3806_p11 = scmp.lt.s32.totalorder %s2840_s30, %s2840_s30 }
 0x162   :  { %p3802_p10 = scmp.ne.s32.totalorder %s2840_s30, %s3801_s5  ;;  %p3807_p12 = scmp.lt.s32.totalorder %s3801_s5, %s3801_s5 }
 0x163   :  { %v3977_v46 = vpop.f32.mrb[12].mxu1  ;;  %v3979_v47 = vpop.f32.mrb[12].mxu0 }
 0x164   :  { %v1473_v48 = vpop.f32.mrb[13].mxu1  ;;  %v1281_v50 = vpop.f32.mrb[13].mxu0  ;;  %p3808_p13 = por %p3807_p12, %p3806_p11 }
 0x165   :  { %v3981_v51 = vpop.f32.mrb[14].mxu1  ;;  %v3983_v53 = vpop.f32.mrb[14].mxu0 }
 0x166   :  { %v1476_v54 = vpop.f32.mrb[15].mxu1  ;;  %v1284_v55 = vpop.f32.mrb[15].mxu0  ;;  %p3809_p0 = pnand %p3808_p13, %p3802_p10 }
 0x168   :  { %1719 = vmatmul.mubr.bf16.gmra.mrb[120].mxu1 %v3697_v49 }
 0x169   :  { %1726 = vmatprep.mubr.bf16.mxu1 %v3701_v52  ;;  %v3719_v52 = vld [vmem:[#allocation3 + $0x368] ss:$16 sps:$4 sm:$0xff]  }
 0x16b   :  { %v3985_v56 = vpop.f32.mrb[16].mxu1  ;;  %v3987_v57 = vpop.f32.mrb[16].mxu0 }
 0x16c   :  { %v1481_v58 = vpop.f32.mrb[17].mxu1  ;;  %v1289_v60 = vpop.f32.mrb[17].mxu0 }
 0x16d   :  { %v3989_v61 = vpop.f32.mrb[18].mxu1  ;;  %v3991_v63 = vpop.f32.mrb[18].mxu0  ;;  %v3722_v58 = vld [vmem:[#allocation3 + $0x38c] ss:$16 sps:$4 sm:$0xff]  }
 0x16e   :  { %v1484_v1 = vpop.f32.mrb[19].mxu1  ;;  %v1292_v2 = vpop.f32.mrb[19].mxu0 }
 0x170   :  { %1727 = vmatmul.mubr.bf16.gmra.mrb[124].mxu1 %v3704_v59 }
 0x171   :  { %1734 = vmatprep.mubr.bf16.mxu1 %v3705_v62 }
 0x173   :  { %v3993_v3 = vpop.f32.mrb[20].mxu1  ;;  %v3995_v4 = vpop.f32.mrb[20].mxu0 }
 0x174   :  { %v1489_v5 = vpop.f32.mrb[21].mxu1  ;;  %v1297_v7 = vpop.f32.mrb[21].mxu0 }
 0x175   :  { %v3997_v8 = vpop.f32.mrb[22].mxu1  ;;  %v3999_v10 = vpop.f32.mrb[22].mxu0 }
 0x176   :  { %v1492_v11 = vpop.f32.mrb[23].mxu1  ;;  %v1300_v12 = vpop.f32.mrb[23].mxu0 }
 0x178   :  { %1735 = vmatmul.mubr.bf16.gmra.mrb[128].mxu1 %v3707_v6 }
 0x179   :  { %1742 = vmatprep.mubr.bf16.mxu1 %v3708_v9 }
 0x17b   :  { %v4001_v0 = vpop.f32.mrb[24].mxu1  ;;  %v4003_v13 = vpop.f32.mrb[24].mxu0 }
 0x17c   :  { %v1497_v14 = vpop.f32.mrb[25].mxu1  ;;  %v1305_v18 = vpop.f32.mrb[25].mxu0 }
 0x17d   :  { %v4005_v19 = vpop.f32.mrb[26].mxu1  ;;  %v4007_v22 = vpop.f32.mrb[26].mxu0 }
 0x17e   :  { %v1500_v24 = vpop.f32.mrb[27].mxu1  ;;  %v1308_v25 = vpop.f32.mrb[27].mxu0 }
 0x17f   :  { %v3726_v24 = vld [vmem:[#allocation3 + $0x3ac] ss:$16 sps:$4 sm:$0xff]  }
 0x180   :  { %1743 = vmatmul.mubr.bf16.gmra.mrb[132].mxu1 %v3710_v15  ;;  %v3724_v15 = vld [vmem:[#allocation3 + $0x388] ss:$16 sps:$4 sm:$0xff]  }
 0x181   :  { %1750 = vmatprep.mubr.bf16.mxu1 %v3712_v20 }
 0x183   :  { %v4009_v28 = vpop.f32.mrb[28].mxu1  ;;  %v4011_v29 = vpop.f32.mrb[28].mxu0 }
 0x184   :  { %v1505_v30 = vpop.f32.mrb[29].mxu1  ;;  %v1313_v34 = vpop.f32.mrb[29].mxu0 }
 0x185   :  { %v4013_v35 = vpop.f32.mrb[30].mxu1  ;;  %v4015_v39 = vpop.f32.mrb[30].mxu0 }
 0x186   :  { %v1508_v40 = vpop.f32.mrb[31].mxu1  ;;  %v1316_v42 = vpop.f32.mrb[31].mxu0 }
 0x188   :  { %1751 = vmatmul.mubr.bf16.gmra.mrb[136].mxu1 %v3714_v32 }
 0x189   :  { %1758 = vmatprep.mubr.bf16.mxu1 %v3717_v38 }
 0x18b   :  { %v1544_v44 = vpop.f32.mrb[32].mxu1  ;;  %v4022_v48 = vpop.f32.mrb[32].mxu0 }
 0x18c   :  { %v1545_v49 = vadd.f32 %v1544_v44, %v3955_v17  ;;  %v1546_v50 = vpop.f32.mrb[33].mxu1  ;;  %v1321_v54 = vpop.f32.mrb[33].mxu0 }
 0x18d   :  { %v1547_v55 = vpop.f32.mrb[34].mxu1  ;;  %v4025_v59 = vpop.f32.mrb[34].mxu0  ;;  %v3728_v54 = vld [vmem:[#allocation3 + $0x3a8] ss:$16 sps:$4 sm:$0xff]  }
 0x18e   :  { %v2001_v60 = vadd.f32 %v4020_v45, %v1545_v49  ;;  %v1548_v62 = vadd.f32 %v1547_v55, %v3959_v23  ;;  %v1549_v1 = vpop.f32.mrb[35].mxu1  ;;  %v1324_v2 = vpop.f32.mrb[35].mxu0 }
 0x190   :  { %v2002_v5 = vadd.f32 %v4020_v45, %v1548_v62  ;;  %1759 = vmatmul.mubr.bf16.gmra.mrb[140].mxu1 %v3719_v52  ;;  %v2065_v6 = vmax.f32 %v2001_v60, 0.0 }
 0x191   :  { %1766 = vmatprep.mubr.bf16.mxu1 %v3722_v58 }
 0x192   :  { %v2066_v7 = vmax.f32 %v2002_v5, 0.0 }
 0x193   :  { %v1552_v17 = vpop.f32.mrb[36].mxu1  ;;  %v4030_v9 = vpop.f32.mrb[36].mxu0 }
 0x194   :  { %v1553_v11 = vadd.f32 %v1552_v17, %v3963_v27  ;;  %v1554_v12 = vpop.f32.mrb[37].mxu1  ;;  %v2129_v14 = vpack.c.bf16 %v2066_v7, %v2065_v6  ;;  %v1329_v18 = vpop.f32.mrb[37].mxu0 }
 0x195   :  { %v1555_v20 = vpop.f32.mrb[38].mxu1  ;;  %v4033_v23 = vpop.f32.mrb[38].mxu0  ;;  %v3731_v18 = vld [vmem:[#allocation3 + $0x3c8] ss:$16 sps:$4 sm:$0xff]  }
 0x196   :  { %v2003_v25 = vadd.f32 %v4020_v45, %v1553_v11  ;;  %v1556_v30 = vadd.f32 %v1555_v20, %v3967_v33  ;;  %v1557_v32 = vpop.f32.mrb[39].mxu1  ;;  %3398 = vmatprep.mubr.bf16.mxu0 %v2129_v14  ;;  %v1332_v34 = vpop.f32.mrb[39].mxu0  ;;  %v3729_v33 = vld [vmem:[#allocation3 + $0x3cc] ss:$16 sps:$4 sm:$0xff]  }
 0x198   :  { %v2004_v38 = vadd.f32 %v4020_v45, %v1556_v30  ;;  %1767 = vmatmul.mubr.bf16.gmra.mrb[144].mxu1 %v3724_v15  ;;  %v2067_v27 = vmax.f32 %v2003_v25, 0.0 }
 0x199   :  { %1774 = vmatprep.mubr.bf16.mxu1 %v3726_v24 }
 0x19a   :  { %v2068_v40 = vmax.f32 %v2004_v38, 0.0 }
 0x19b   :  { %v1560_v42 = vpop.f32.mrb[40].mxu1  ;;  %v4038_v44 = vpop.f32.mrb[40].mxu0 }
 0x19c   :  { %v2130_v49 = vpack.c.bf16 %v2068_v40, %v2067_v27  ;;  %v1561_v50 = vadd.f32 %v1560_v42, %v3971_v37  ;;  %v1562_v52 = vpop.f32.mrb[41].mxu1  ;;  %v1337_v55 = vpop.f32.mrb[41].mxu0 }
 0x19d   :  { %v1563_v58 = vpop.f32.mrb[42].mxu1  ;;  %v4041_v60 = vpop.f32.mrb[42].mxu0  ;;  %v3734_v55 = vld [vmem:[#allocation3 + $0x3e8] ss:$16 sps:$4 sm:$0xff]  }
 0x19e   :  { %v2005_v62 = vadd.f32 %v4020_v45, %v1561_v50  ;;  %v1564_v1 = vadd.f32 %v1563_v58, %v3975_v43  ;;  %v1565_v2 = vpop.f32.mrb[43].mxu1  ;;  %3399 = vmatmul.mubr.bf16.vlgmr.msra.gmra.mrb[96].mxu0 %v2130_v49  ;;  %v1340_v5 = vpop.f32.mrb[43].mxu0  ;;  %v3732_v43 = vld [vmem:[#allocation3 + $0x3ec] ss:$16 sps:$4 sm:$0xff]  }
 0x1a0   :  { %v2006_v6 = vadd.f32 %v4020_v45, %v1564_v1  ;;  %1775 = vmatmul.mubr.bf16.gmra.mrb[148].mxu1 %v3728_v54  ;;  %v2069_v7 = vmax.f32 %v2005_v62, 0.0 }
 0x1a1   :  { %1782 = vmatprep.mubr.bf16.mxu1 %v3729_v33 }
 0x1a2   :  { %v2070_v37 = vmax.f32 %v2006_v6, 0.0 }
 0x1a3   :  { %v1568_v17 = vpop.f32.mrb[44].mxu1  ;;  %v4046_v11 = vpop.f32.mrb[44].mxu0 }
 0x1a4   :  { %v1569_v12 = vadd.f32 %v1568_v17, %v3979_v47  ;;  %v1570_v14 = vpop.f32.mrb[45].mxu1  ;;  %v2131_v15 = vpack.c.bf16 %v2070_v37, %v2069_v7  ;;  %v1345_v20 = vpop.f32.mrb[45].mxu0 }
 0x1a5   :  { %v1571_v24 = vpop.f32.mrb[46].mxu1  ;;  %v4049_v25 = vpop.f32.mrb[46].mxu0 }
 0x1a6   :  { %v2007_v30 = vadd.f32 %v4020_v45, %v1569_v12  ;;  %v1572_v32 = vadd.f32 %v1571_v24, %v3983_v53  ;;  %v1573_v34 = vpop.f32.mrb[47].mxu1  ;;  %3402 = vmatprep.mubr.bf16.mxu0 %v2131_v15  ;;  %v1348_v38 = vpop.f32.mrb[47].mxu0 }
 0x1a8   :  { %v2008_v27 = vadd.f32 %v4020_v45, %v1572_v32  ;;  %1783 = vmatmul.mubr.bf16.gmra.mrb[152].mxu1 %v3731_v18  ;;  %v2071_v47 = vmax.f32 %v2007_v30, 0.0 }
 0x1a9   :  { %1790 = vmatprep.mubr.bf16.mxu1 %v3732_v43 }
 0x1aa   :  { %v2072_v40 = vmax.f32 %v2008_v27, 0.0 }
 0x1ab   :  { %v1576_v42 = vpop.f32.mrb[48].mxu1  ;;  %v4054_v49 = vpop.f32.mrb[48].mxu0 }
 0x1ac   :  { %v1577_v50 = vadd.f32 %v1576_v42, %v3987_v57  ;;  %v1578_v52 = vpop.f32.mrb[49].mxu1  ;;  %v2132_v54 = vpack.c.bf16 %v2072_v40, %v2071_v47  ;;  %v1353_v58 = vpop.f32.mrb[49].mxu0 }
 0x1ad   :  { %v1579_v33 = vpop.f32.mrb[50].mxu1  ;;  %v4057_v53 = vpop.f32.mrb[50].mxu0 }
 0x1ae   :  { %v2009_v62 = vadd.f32 %v4020_v45, %v1577_v50  ;;  %v1580_v1 = vadd.f32 %v1579_v33, %v3991_v63  ;;  %v1581_v2 = vpop.f32.mrb[51].mxu1  ;;  %3403 = vmatmul.mubr.bf16.gmra.mrb[100].mxu0 %v2132_v54  ;;  %v1356_v5 = vpop.f32.mrb[51].mxu0 }
 0x1b0   :  { %v2010_v6 = vadd.f32 %v4020_v45, %v1580_v1  ;;  %1791 = vmatmul.mubr.bf16.gmra.mrb[156].mxu1 %v3734_v55  ;;  %v2073_v7 = vmax.f32 %v2009_v62, 0.0 }
 0x1b2   :  { %v2074_v37 = vmax.f32 %v2010_v6, 0.0 }
 0x1b3   :  { %v1584_v57 = vpop.f32.mrb[52].mxu1  ;;  %v4062_v17 = vpop.f32.mrb[52].mxu0 }
 0x1b4   :  { %v1585_v12 = vadd.f32 %v1584_v57, %v3995_v4  ;;  %v1586_v14 = vpop.f32.mrb[53].mxu1  ;;  %v2133_v15 = vpack.c.bf16 %v2074_v37, %v2073_v7  ;;  %v1361_v18 = vpop.f32.mrb[53].mxu0 }
 0x1b5   :  { %v1587_v20 = vpop.f32.mrb[54].mxu1  ;;  %v4065_v24 = vpop.f32.mrb[54].mxu0 }
 0x1b6   :  { %v2011_v63 = vadd.f32 %v4020_v45, %v1585_v12  ;;  %v1588_v43 = vadd.f32 %v1587_v20, %v3999_v10  ;;  %v1589_v30 = vpop.f32.mrb[55].mxu1  ;;  %3406 = vmatprep.mubr.bf16.mxu0 %v2133_v15  ;;  %v1364_v32 = vpop.f32.mrb[55].mxu0 }
 0x1b8   :  { %v2012_v34 = vadd.f32 %v4020_v45, %v1588_v43  ;;  %v2075_v38 = vmax.f32 %v2011_v63, 0.0 }
 0x1ba   :  { %v2076_v27 = vmax.f32 %v2012_v34, 0.0 }
 0x1bb   :  { %v1592_v47 = vpop.f32.mrb[56].mxu1  ;;  %v4070_v40 = vpop.f32.mrb[56].mxu0 }
 0x1bc   :  { %v1593_v4 = vadd.f32 %v1592_v47, %v4003_v13  ;;  %v1594_v42 = vpop.f32.mrb[57].mxu1  ;;  %v2134_v50 = vpack.c.bf16 %v2076_v27, %v2075_v38  ;;  %v1369_v52 = vpop.f32.mrb[57].mxu0 }
 0x1bd   :  { %v1595_v54 = vpop.f32.mrb[58].mxu1  ;;  %v4073_v55 = vpop.f32.mrb[58].mxu0 }
 0x1be   :  { %v2013_v10 = vadd.f32 %v4020_v45, %v1593_v4  ;;  %v1596_v58 = vadd.f32 %v1595_v54, %v4007_v22  ;;  %v1597_v33 = vpop.f32.mrb[59].mxu1  ;;  %3407 = vmatmul.mubr.bf16.gmra.mrb[104].mxu0 %v2134_v50  ;;  %v1372_v62 = vpop.f32.mrb[59].mxu0 }
 0x1c0   :  { %v2014_v1 = vadd.f32 %v4020_v45, %v1596_v58  ;;  %v2077_v2 = vmax.f32 %v2013_v10, 0.0 }
 0x1c2   :  { %v2078_v5 = vmax.f32 %v2014_v1, 0.0 }
 0x1c3   :  { %v1600_v6 = vpop.f32.mrb[60].mxu1  ;;  %v4078_v7 = vpop.f32.mrb[60].mxu0 }
 0x1c4   :  { %v1601_v13 = vadd.f32 %v1600_v6, %v4011_v29  ;;  %v1602_v37 = vpop.f32.mrb[61].mxu1  ;;  %v2135_v57 = vpack.c.bf16 %v2078_v5, %v2077_v2  ;;  %v1377_v12 = vpop.f32.mrb[61].mxu0 }
 0x1c5   :  { %v1603_v14 = vpop.f32.mrb[62].mxu1  ;;  %v4081_v15 = vpop.f32.mrb[62].mxu0 }
 0x1c6   :  { %v2015_v22 = vadd.f32 %v4020_v45, %v1601_v13  ;;  %v1604_v18 = vadd.f32 %v1603_v14, %v4015_v39  ;;  %v1605_v20 = vpop.f32.mrb[63].mxu1  ;;  %3410 = vmatprep.mubr.bf16.mxu0 %v2135_v57  ;;  %v1380_v63 = vpop.f32.mrb[63].mxu0 }
 0x1c8   :  { %v2016_v43 = vadd.f32 %v4020_v45, %v1604_v18  ;;  %v2079_v30 = vmax.f32 %v2015_v22, 0.0 }
 0x1ca   :  { %v2080_v32 = vmax.f32 %v2016_v43, 0.0 }
 0x1cb   :  { %v1608_v34 = vpop.f32.mrb[64].mxu1  ;;  %v4086_v38 = vpop.f32.mrb[64].mxu0 }
 0x1cc   :  { %v1609_v29 = vadd.f32 %v1608_v34, %v4022_v48  ;;  %v1610_v27 = vpop.f32.mrb[65].mxu1  ;;  %v2136_v47 = vpack.c.bf16 %v2080_v32, %v2079_v30  ;;  %v1385_v4 = vpop.f32.mrb[65].mxu0 }
 0x1cd   :  { %v1611_v42 = vpop.f32.mrb[66].mxu1  ;;  %v4089_v50 = vpop.f32.mrb[66].mxu0 }
 0x1ce   :  { %v2017_v39 = vadd.f32 %v4020_v45, %v1609_v29  ;;  %v1612_v52 = vadd.f32 %v1611_v42, %v4025_v59  ;;  %v1613_v54 = vpop.f32.mrb[67].mxu1  ;;  %3411 = vmatmul.mubr.bf16.gmra.mrb[108].mxu0 %v2136_v47  ;;  %v1388_v10 = vpop.f32.mrb[67].mxu0 }
 0x1d0   :  { %v2018_v58 = vadd.f32 %v4020_v45, %v1612_v52  ;;  %v2081_v33 = vmax.f32 %v2017_v39, 0.0 }
 0x1d2   :  { %v2082_v62 = vmax.f32 %v2018_v58, 0.0 }
 0x1d3   :  { %v1616_v1 = vpop.f32.mrb[68].mxu1  ;;  %v4094_v2 = vpop.f32.mrb[68].mxu0 }
 0x1d4   :  { %v1617_v48 = vadd.f32 %v1616_v1, %v4030_v9  ;;  %v1618_v5 = vpop.f32.mrb[69].mxu1  ;;  %v2137_v6 = vpack.c.bf16 %v2082_v62, %v2081_v33  ;;  %v1393_v13 = vpop.f32.mrb[69].mxu0 }
 0x1d5   :  { %v1619_v37 = vpop.f32.mrb[70].mxu1  ;;  %v4097_v57 = vpop.f32.mrb[70].mxu0 }
 0x1d6   :  { %v2019_v59 = vadd.f32 %v4020_v45, %v1617_v48  ;;  %v1620_v12 = vadd.f32 %v1619_v37, %v4033_v23  ;;  %v1621_v14 = vpop.f32.mrb[71].mxu1  ;;  %3414 = vmatprep.mubr.bf16.mxu0 %v2137_v6  ;;  %v1396_v22 = vpop.f32.mrb[71].mxu0 }
 0x1d8   :  { %v2020_v18 = vadd.f32 %v4020_v45, %v1620_v12  ;;  %v2083_v20 = vmax.f32 %v2019_v59, 0.0 }
 0x1da   :  { %v2084_v63 = vmax.f32 %v2020_v18, 0.0 }
 0x1db   :  { %v1624_v43 = vpop.f32.mrb[72].mxu1  ;;  %v4102_v30 = vpop.f32.mrb[72].mxu0 }
 0x1dc   :  { %v1625_v9 = vadd.f32 %v1624_v43, %v4038_v44  ;;  %v1626_v32 = vpop.f32.mrb[73].mxu1  ;;  %v2138_v34 = vpack.c.bf16 %v2084_v63, %v2083_v20  ;;  %v1401_v29 = vpop.f32.mrb[73].mxu0 }
 0x1dd   :  { %v1627_v27 = vpop.f32.mrb[74].mxu1  ;;  %v4105_v47 = vpop.f32.mrb[74].mxu0 }
 0x1de   :  { %v2021_v23 = vadd.f32 %v4020_v45, %v1625_v9  ;;  %v1628_v4 = vadd.f32 %v1627_v27, %v4041_v60  ;;  %v1629_v42 = vpop.f32.mrb[75].mxu1  ;;  %3415 = vmatmul.mubr.bf16.gmra.mrb[112].mxu0 %v2138_v34  ;;  %v1404_v39 = vpop.f32.mrb[75].mxu0 }
 0x1e0   :  { %v2022_v52 = vadd.f32 %v4020_v45, %v1628_v4  ;;  %v2085_v54 = vmax.f32 %v2021_v23, 0.0 }
 0x1e2   :  { %v2086_v10 = vmax.f32 %v2022_v52, 0.0 }
 0x1e3   :  { %v1632_v58 = vpop.f32.mrb[76].mxu1  ;;  %v4110_v33 = vpop.f32.mrb[76].mxu0 }
 0x1e4   :  { %v1633_v44 = vadd.f32 %v1632_v58, %v4046_v11  ;;  %v1634_v62 = vpop.f32.mrb[77].mxu1  ;;  %v2139_v1 = vpack.c.bf16 %v2086_v10, %v2085_v54  ;;  %v1409_v48 = vpop.f32.mrb[77].mxu0 }
 0x1e5   :  { %v1635_v5 = vpop.f32.mrb[78].mxu1  ;;  %v4113_v6 = vpop.f32.mrb[78].mxu0 }
 0x1e6   :  { %v2023_v60 = vadd.f32 %v4020_v45, %v1633_v44  ;;  %v1636_v13 = vadd.f32 %v1635_v5, %v4049_v25  ;;  %v1637_v37 = vpop.f32.mrb[79].mxu1  ;;  %3418 = vmatprep.mubr.bf16.mxu0 %v2139_v1  ;;  %v1412_v59 = vpop.f32.mrb[79].mxu0 }
 0x1e8   :  { %v2024_v12 = vadd.f32 %v4020_v45, %v1636_v13  ;;  %v2087_v14 = vmax.f32 %v2023_v60, 0.0 }
 0x1ea   :  { %v2088_v22 = vmax.f32 %v2024_v12, 0.0 }
 0x1eb   :  { %v1640_v18 = vpop.f32.mrb[80].mxu1  ;;  %v4118_v20 = vpop.f32.mrb[80].mxu0 }
 0x1ec   :  { %v1641_v11 = vadd.f32 %v1640_v18, %v4054_v49  ;;  %v1642_v63 = vpop.f32.mrb[81].mxu1  ;;  %v2140_v43 = vpack.c.bf16 %v2088_v22, %v2087_v14  ;;  %v1417_v9 = vpop.f32.mrb[81].mxu0 }
 0x1ed   :  { %v1643_v32 = vpop.f32.mrb[82].mxu1  ;;  %v4121_v34 = vpop.f32.mrb[82].mxu0 }
 0x1ee   :  { %v2025_v25 = vadd.f32 %v4020_v45, %v1641_v11  ;;  %v1644_v29 = vadd.f32 %v1643_v32, %v4057_v53  ;;  %v1645_v27 = vpop.f32.mrb[83].mxu1  ;;  %3419 = vmatmul.mubr.bf16.gmra.mrb[116].mxu0 %v2140_v43  ;;  %v1420_v23 = vpop.f32.mrb[83].mxu0 }
 0x1f0   :  { %v2026_v4 = vadd.f32 %v4020_v45, %v1644_v29  ;;  %v2089_v42 = vmax.f32 %v2025_v25, 0.0 }
 0x1f2   :  { %v2090_v39 = vmax.f32 %v2026_v4, 0.0 }
 0x1f3   :  { %v1648_v52 = vpop.f32.mrb[84].mxu1  ;;  %v4126_v54 = vpop.f32.mrb[84].mxu0 }
 0x1f4   :  { %v1649_v49 = vadd.f32 %v1648_v52, %v4062_v17  ;;  %v1650_v10 = vpop.f32.mrb[85].mxu1  ;;  %v2141_v58 = vpack.c.bf16 %v2090_v39, %v2089_v42  ;;  %v1425_v44 = vpop.f32.mrb[85].mxu0 }
 0x1f5   :  { %v1651_v62 = vpop.f32.mrb[86].mxu1  ;;  %v4129_v1 = vpop.f32.mrb[86].mxu0 }
 0x1f6   :  { %v2027_v53 = vadd.f32 %v4020_v45, %v1649_v49  ;;  %v1652_v48 = vadd.f32 %v1651_v62, %v4065_v24  ;;  %v1653_v5 = vpop.f32.mrb[87].mxu1  ;;  %3422 = vmatprep.mubr.bf16.mxu0 %v2141_v58  ;;  %v1428_v60 = vpop.f32.mrb[87].mxu0 }
 0x1f8   :  { %v2028_v13 = vadd.f32 %v4020_v45, %v1652_v48  ;;  %v2091_v37 = vmax.f32 %v2027_v53, 0.0 }
 0x1fa   :  { %v2092_v59 = vmax.f32 %v2028_v13, 0.0 }
 0x1fb   :  { %v1656_v12 = vpop.f32.mrb[88].mxu1  ;;  %v4134_v14 = vpop.f32.mrb[88].mxu0 }
 0x1fc   :  { %v1657_v17 = vadd.f32 %v1656_v12, %v4070_v40  ;;  %v1658_v22 = vpop.f32.mrb[89].mxu1  ;;  %v2142_v18 = vpack.c.bf16 %v2092_v59, %v2091_v37  ;;  %v1433_v11 = vpop.f32.mrb[89].mxu0 }
 0x1fd   :  { %v1659_v63 = vpop.f32.mrb[90].mxu1  ;;  %v4137_v43 = vpop.f32.mrb[90].mxu0 }
 0x1fe   :  { %v2029_v24 = vadd.f32 %v4020_v45, %v1657_v17  ;;  %v1660_v9 = vadd.f32 %v1659_v63, %v4073_v55  ;;  %v1661_v32 = vpop.f32.mrb[91].mxu1  ;;  %3423 = vmatmul.mubr.bf16.gmra.mrb[120].mxu0 %v2142_v18  ;;  %v1436_v25 = vpop.f32.mrb[91].mxu0 }
 0x200   :  { %v2030_v29 = vadd.f32 %v4020_v45, %v1660_v9  ;;  %v2093_v27 = vmax.f32 %v2029_v24, 0.0 }
 0x202   :  { %v2094_v23 = vmax.f32 %v2030_v29, 0.0 }
 0x203   :  { %v1664_v4 = vpop.f32.mrb[92].mxu1  ;;  %v4142_v42 = vpop.f32.mrb[92].mxu0 }
 0x204   :  { %v1665_v40 = vadd.f32 %v1664_v4, %v4078_v7  ;;  %v1666_v39 = vpop.f32.mrb[93].mxu1  ;;  %v2143_v52 = vpack.c.bf16 %v2094_v23, %v2093_v27  ;;  %v1441_v49 = vpop.f32.mrb[93].mxu0 }
 0x205   :  { %v1667_v10 = vpop.f32.mrb[94].mxu1  ;;  %v4145_v58 = vpop.f32.mrb[94].mxu0 }
 0x206   :  { %v2031_v55 = vadd.f32 %v4020_v45, %v1665_v40  ;;  %v1668_v44 = vadd.f32 %v1667_v10, %v4081_v15  ;;  %v1669_v62 = vpop.f32.mrb[95].mxu1  ;;  %3426 = vmatprep.mubr.bf16.mxu0 %v2143_v52  ;;  %v1444_v53 = vpop.f32.mrb[95].mxu0 }
 0x208   :  { %v2032_v48 = vadd.f32 %v4020_v45, %v1668_v44  ;;  %v2095_v5 = vmax.f32 %v2031_v55, 0.0 }
 0x20a   :  { %v2096_v60 = vmax.f32 %v2032_v48, 0.0 }
 0x20b   :  { %v1672_v13 = vpop.f32.mrb[96].mxu1 }
 0x20c   :  { %v1673_v7 = vadd.f32 %v1672_v13, %v4086_v38  ;;  %v1674_v37 = vpop.f32.mrb[97].mxu1  ;;  %v2144_v59 = vpack.c.bf16 %v2096_v60, %v2095_v5 }
 0x20d   :  { %v1675_v12 = vpop.f32.mrb[98].mxu1 }
 0x20e   :  { %v2033_v17 = vadd.f32 %v4020_v45, %v1673_v7  ;;  %v1676_v22 = vadd.f32 %v1675_v12, %v4089_v50  ;;  %v1677_v18 = vpop.f32.mrb[99].mxu1  ;;  %3427 = vmatmul.mubr.bf16.gmra.mrb[124].mxu0 %v2144_v59 }
 0x210   :  { %v2034_v15 = vadd.f32 %v4020_v45, %v1676_v22  ;;  %v2097_v11 = vmax.f32 %v2033_v17, 0.0 }
 0x212   :  { %v2098_v63 = vmax.f32 %v2034_v15, 0.0 }
 0x213   :  { %v1680_v24 = vpop.f32.mrb[100].mxu1 }
 0x214   :  { %v1681_v9 = vadd.f32 %v1680_v24, %v4094_v2  ;;  %v1682_v32 = vpop.f32.mrb[101].mxu1  ;;  %v2145_v25 = vpack.c.bf16 %v2098_v63, %v2097_v11 }
 0x215   :  { %v1683_v29 = vpop.f32.mrb[102].mxu1 }
 0x216   :  { %v2035_v38 = vadd.f32 %v4020_v45, %v1681_v9  ;;  %v1684_v27 = vadd.f32 %v1683_v29, %v4097_v57  ;;  %v1685_v23 = vpop.f32.mrb[103].mxu1  ;;  %3430 = vmatprep.mubr.bf16.mxu0 %v2145_v25 }
 0x218   :  { %v2036_v50 = vadd.f32 %v4020_v45, %v1684_v27  ;;  %v2099_v4 = vmax.f32 %v2035_v38, 0.0 }
 0x21a   :  { %v2100_v40 = vmax.f32 %v2036_v50, 0.0 }
 0x21b   :  { %v1688_v39 = vpop.f32.mrb[104].mxu1 }
 0x21c   :  { %v1689_v52 = vadd.f32 %v1688_v39, %v4102_v30  ;;  %v1690_v49 = vpop.f32.mrb[105].mxu1  ;;  %v2146_v10 = vpack.c.bf16 %v2100_v40, %v2099_v4 }
 0x21d   :  { %v1691_v55 = vpop.f32.mrb[106].mxu1 }
 0x21e   :  { %v2037_v2 = vadd.f32 %v4020_v45, %v1689_v52  ;;  %v1692_v44 = vadd.f32 %v1691_v55, %v4105_v47  ;;  %v1693_v62 = vpop.f32.mrb[107].mxu1  ;;  %3431 = vmatmul.mubr.bf16.gmra.mrb[128].mxu0 %v2146_v10 }
 0x220   :  { %v2038_v57 = vadd.f32 %v4020_v45, %v1692_v44  ;;  %v2101_v53 = vmax.f32 %v2037_v2, 0.0 }
 0x222   :  { %v2102_v48 = vmax.f32 %v2038_v57, 0.0 }
 0x223   :  { %v1696_v5 = vpop.f32.mrb[108].mxu1 }
 0x224   :  { %v1697_v60 = vadd.f32 %v1696_v5, %v4110_v33  ;;  %v1698_v13 = vpop.f32.mrb[109].mxu1  ;;  %v2147_v7 = vpack.c.bf16 %v2102_v48, %v2101_v53 }
 0x225   :  { %v1699_v37 = vpop.f32.mrb[110].mxu1 }
 0x226   :  { %v2039_v30 = vadd.f32 %v4020_v45, %v1697_v60  ;;  %v1700_v59 = vadd.f32 %v1699_v37, %v4113_v6  ;;  %v1701_v12 = vpop.f32.mrb[111].mxu1  ;;  %3434 = vmatprep.mubr.bf16.mxu0 %v2147_v7 }
 0x228   :  { %v2040_v47 = vadd.f32 %v4020_v45, %v1700_v59  ;;  %v2103_v17 = vmax.f32 %v2039_v30, 0.0 }
 0x22a   :  { %v2104_v22 = vmax.f32 %v2040_v47, 0.0 }
 0x22b   :  { %v1704_v18 = vpop.f32.mrb[112].mxu1 }
 0x22c   :  { %v1705_v15 = vadd.f32 %v1704_v18, %v4118_v20  ;;  %v1706_v11 = vpop.f32.mrb[113].mxu1  ;;  %v2148_v63 = vpack.c.bf16 %v2104_v22, %v2103_v17 }
 0x22d   :  { %v1707_v24 = vpop.f32.mrb[114].mxu1 }
 0x22e   :  { %v2041_v33 = vadd.f32 %v4020_v45, %v1705_v15  ;;  %v1708_v9 = vadd.f32 %v1707_v24, %v4121_v34  ;;  %v1709_v32 = vpop.f32.mrb[115].mxu1  ;;  %3435 = vmatmul.mubr.bf16.gmra.mrb[132].mxu0 %v2148_v63 }
 0x230   :  { %v2042_v6 = vadd.f32 %v4020_v45, %v1708_v9  ;;  %v2105_v25 = vmax.f32 %v2041_v33, 0.0 }
 0x232   :  { %v2106_v29 = vmax.f32 %v2042_v6, 0.0 }
 0x233   :  { %v1712_v38 = vpop.f32.mrb[116].mxu1 }
 0x234   :  { %v1713_v27 = vadd.f32 %v1712_v38, %v4126_v54  ;;  %v1714_v23 = vpop.f32.mrb[117].mxu1  ;;  %v2149_v50 = vpack.c.bf16 %v2106_v29, %v2105_v25 }
 0x235   :  { %v1715_v4 = vpop.f32.mrb[118].mxu1 }
 0x236   :  { %v2043_v20 = vadd.f32 %v4020_v45, %v1713_v27  ;;  %v1716_v40 = vadd.f32 %v1715_v4, %v4129_v1  ;;  %v1717_v39 = vpop.f32.mrb[119].mxu1  ;;  %3438 = vmatprep.mubr.bf16.mxu0 %v2149_v50 }
 0x238   :  { %v2044_v34 = vadd.f32 %v4020_v45, %v1716_v40  ;;  %v2107_v52 = vmax.f32 %v2043_v20, 0.0 }
 0x23a   :  { %v2108_v49 = vmax.f32 %v2044_v34, 0.0 }
 0x23b   :  { %v1720_v10 = vpop.f32.mrb[120].mxu1 }
 0x23c   :  { %v1721_v55 = vadd.f32 %v1720_v10, %v4134_v14  ;;  %v1722_v2 = vpop.f32.mrb[121].mxu1  ;;  %v2150_v44 = vpack.c.bf16 %v2108_v49, %v2107_v52 }
 0x23d   :  { %v1723_v62 = vpop.f32.mrb[122].mxu1 }
 0x23e   :  { %v2045_v54 = vadd.f32 %v4020_v45, %v1721_v55  ;;  %v1724_v57 = vadd.f32 %v1723_v62, %v4137_v43  ;;  %v1725_v53 = vpop.f32.mrb[123].mxu1  ;;  %3439 = vmatmul.mubr.bf16.gmra.mrb[136].mxu0 %v2150_v44 }
 0x240   :  { %v2046_v1 = vadd.f32 %v4020_v45, %v1724_v57  ;;  %v2109_v48 = vmax.f32 %v2045_v54, 0.0 }
 0x242   :  { %v2110_v5 = vmax.f32 %v2046_v1, 0.0 }
 0x243   :  { %v1728_v60 = vpop.f32.mrb[124].mxu1 }
 0x244   :  { %v1729_v13 = vadd.f32 %v1728_v60, %v4142_v42  ;;  %v1730_v7 = vpop.f32.mrb[125].mxu1  ;;  %v2151_v37 = vpack.c.bf16 %v2110_v5, %v2109_v48 }
 0x245   :  { %v1731_v30 = vpop.f32.mrb[126].mxu1 }
 0x246   :  { %v2047_v14 = vadd.f32 %v4020_v45, %v1729_v13  ;;  %v1732_v59 = vadd.f32 %v1731_v30, %v4145_v58  ;;  %v1733_v12 = vpop.f32.mrb[127].mxu1  ;;  %3442 = vmatprep.mubr.bf16.mxu0 %v2151_v37 }
 0x248   :  { %v2048_v43 = vadd.f32 %v4020_v45, %v1732_v59  ;;  %v2111_v47 = vmax.f32 %v2047_v14, 0.0 }
 0x24a   :  { %v2112_v17 = vmax.f32 %v2048_v43, 0.0 }
 0x24b   :  { %v1736_v22 = vpop.f32.mrb[128].mxu1 }
 0x24c   :  { %v1737_v18 = vadd.f32 %v1736_v22, %v3953_v16  ;;  %v1738_v15 = vpop.f32.mrb[129].mxu1  ;;  %v2152_v11 = vpack.c.bf16 %v2112_v17, %v2111_v47 }
 0x24d   :  { %v1739_v63 = vpop.f32.mrb[130].mxu1 }
 0x24e   :  { %v2049_v42 = vadd.f32 %v4020_v45, %v1737_v18  ;;  %v1740_v24 = vadd.f32 %v1739_v63, %v3957_v21  ;;  %v1741_v33 = vpop.f32.mrb[131].mxu1  ;;  %3443 = vmatmul.mubr.bf16.gmra.mrb[140].mxu0 %v2152_v11 }
 0x250   :  { %v2050_v58 = vadd.f32 %v4020_v45, %v1740_v24  ;;  %v2113_v9 = vmax.f32 %v2049_v42, 0.0 }
 0x252   :  { %v2114_v32 = vmax.f32 %v2050_v58, 0.0 }
 0x253   :  { %v1744_v6 = vpop.f32.mrb[132].mxu1 }
 0x254   :  { %v1745_v25 = vadd.f32 %v1744_v6, %v3961_v26  ;;  %v1746_v29 = vpop.f32.mrb[133].mxu1  ;;  %v2153_v38 = vpack.c.bf16 %v2114_v32, %v2113_v9 }
 0x255   :  { %v1747_v27 = vpop.f32.mrb[134].mxu1 }
 0x256   :  { %v2051_v16 = vadd.f32 %v4020_v45, %v1745_v25  ;;  %v1748_v23 = vadd.f32 %v1747_v27, %v3965_v31  ;;  %v1749_v50 = vpop.f32.mrb[135].mxu1  ;;  %3446 = vmatprep.mubr.bf16.mxu0 %v2153_v38 }
 0x258   :  { %v2052_v21 = vadd.f32 %v4020_v45, %v1748_v23  ;;  %v2115_v4 = vmax.f32 %v2051_v16, 0.0 }
 0x25a   :  { %v2116_v20 = vmax.f32 %v2052_v21, 0.0 }
 0x25b   :  { %v1752_v40 = vpop.f32.mrb[136].mxu1 }
 0x25c   :  { %v1753_v39 = vadd.f32 %v1752_v40, %v3969_v36  ;;  %v1754_v34 = vpop.f32.mrb[137].mxu1  ;;  %v2154_v52 = vpack.c.bf16 %v2116_v20, %v2115_v4 }
 0x25d   :  { %v1755_v49 = vpop.f32.mrb[138].mxu1 }
 0x25e   :  { %v2053_v26 = vadd.f32 %v4020_v45, %v1753_v39  ;;  %v1756_v10 = vadd.f32 %v1755_v49, %v3973_v41  ;;  %v1757_v55 = vpop.f32.mrb[139].mxu1  ;;  %3447 = vmatmul.mubr.bf16.gmra.mrb[144].mxu0 %v2154_v52 }
 0x260   :  { %v2054_v31 = vadd.f32 %v4020_v45, %v1756_v10  ;;  %v2117_v2 = vmax.f32 %v2053_v26, 0.0 }
 0x262   :  { %v2118_v44 = vmax.f32 %v2054_v31, 0.0 }
 0x263   :  { %v1760_v62 = vpop.f32.mrb[140].mxu1 }
 0x264   :  { %v1761_v54 = vadd.f32 %v1760_v62, %v3977_v46  ;;  %v1762_v57 = vpop.f32.mrb[141].mxu1  ;;  %v2155_v53 = vpack.c.bf16 %v2118_v44, %v2117_v2 }
 0x265   :  { %v1763_v1 = vpop.f32.mrb[142].mxu1 }
 0x266   :  { %v2055_v36 = vadd.f32 %v4020_v45, %v1761_v54  ;;  %v1764_v48 = vadd.f32 %v1763_v1, %v3981_v51  ;;  %v1765_v5 = vpop.f32.mrb[143].mxu1  ;;  %3450 = vmatprep.mubr.bf16.mxu0 %v2155_v53 }
 0x268   :  { %v2056_v41 = vadd.f32 %v4020_v45, %v1764_v48  ;;  %v2119_v60 = vmax.f32 %v2055_v36, 0.0 }
 0x26a   :  { %v2120_v13 = vmax.f32 %v2056_v41, 0.0 }
 0x26b   :  { %v1768_v7 = vpop.f32.mrb[144].mxu1 }
 0x26c   :  { %v1769_v37 = vadd.f32 %v1768_v7, %v3985_v56  ;;  %v1770_v30 = vpop.f32.mrb[145].mxu1  ;;  %v2156_v14 = vpack.c.bf16 %v2120_v13, %v2119_v60 }
 0x26d   :  { %v1771_v59 = vpop.f32.mrb[146].mxu1 }
 0x26e   :  { %v2057_v46 = vadd.f32 %v4020_v45, %v1769_v37  ;;  %v1772_v12 = vadd.f32 %v1771_v59, %v3989_v61  ;;  %v1773_v43 = vpop.f32.mrb[147].mxu1  ;;  %3451 = vmatmul.mubr.bf16.gmra.mrb[148].mxu0 %v2156_v14 }
 0x270   :  { %v2058_v51 = vadd.f32 %v4020_v45, %v1772_v12  ;;  %v2121_v17 = vmax.f32 %v2057_v46, 0.0 }
 0x271   :  { %v3400_v47 = vpop.f32.mrb[96].mxu0 }
 0x272   :  { %v2122_v22 = vmax.f32 %v2058_v51, 0.0  ;;  %v2259_v18 = vpop.f32.mrb[97].mxu0 }
 0x273   :  { %v1776_v15 = vpop.f32.mrb[148].mxu1  ;;  %v3401_v11 = vpop.f32.mrb[98].mxu0 }
 0x274   :  { %v1777_v63 = vadd.f32 %v1776_v15, %v3993_v3  ;;  %v3159_v56 = vpack.c.bf16 %v3401_v11, %v3400_v47  ;;  %v1778_v42 = vpop.f32.mrb[149].mxu1  ;;  %v2262_v24 = vpop.f32.mrb[99].mxu0  ;;  %v2157_v33 = vpack.c.bf16 %v2122_v22, %v2121_v17 }
 0x275   :  { %v3154_v58 = vpack.c.bf16 %v2262_v24, %v2259_v18  ;;  %v1779_v9 = vpop.f32.mrb[150].mxu1 }
 0x276   :  { %v2059_v61 = vadd.f32 %v4020_v45, %v1777_v63  ;;  %3311 = vst [vmem:[#allocation9 + $0x8] sm:$0xff] %v3159_v56   ;;  %v1780_v32 = vadd.f32 %v1779_v9, %v3997_v8  ;;  %v1781_v6 = vpop.f32.mrb[151].mxu1  ;;  %3454 = vmatprep.mubr.bf16.mxu0 %v2157_v33 }
 0x277   :  { %3155 = vst [vmem:[#allocation9] sm:$0xff] %v3154_v58  }
 0x278   :  { %v2060_v25 = vadd.f32 %v4020_v45, %v1780_v32  ;;  %v2123_v29 = vmax.f32 %v2059_v61, 0.0 }
 0x27a   :  { %v2124_v38 = vmax.f32 %v2060_v25, 0.0 }
 0x27b   :  { %v1784_v27 = vpop.f32.mrb[152].mxu1 }
 0x27c   :  { %v1785_v3 = vadd.f32 %v1784_v27, %v4001_v0  ;;  %v1786_v16 = vpop.f32.mrb[153].mxu1  ;;  %v2158_v23 = vpack.c.bf16 %v2124_v38, %v2123_v29 }
 0x27d   :  { %v1787_v50 = vpop.f32.mrb[154].mxu1 }
 0x27e   :  { %v2061_v21 = vadd.f32 %v4020_v45, %v1785_v3  ;;  %v1788_v4 = vadd.f32 %v1787_v50, %v4005_v19  ;;  %v1789_v20 = vpop.f32.mrb[155].mxu1  ;;  %3455 = vmatmul.mubr.bf16.gmra.mrb[152].mxu0 %v2158_v23 }
 0x280   :  { %v2062_v8 = vadd.f32 %v4020_v45, %v1788_v4  ;;  %v2125_v39 = vmax.f32 %v2061_v21, 0.0 }
 0x281   :  { %v3404_v40 = vpop.f32.mrb[100].mxu0 }
 0x282   :  { %v2126_v34 = vmax.f32 %v2062_v8, 0.0  ;;  %v2275_v52 = vpop.f32.mrb[101].mxu0 }
 0x283   :  { %v1792_v49 = vpop.f32.mrb[156].mxu1  ;;  %v3405_v26 = vpop.f32.mrb[102].mxu0 }
 0x284   :  { %v1793_v10 = vadd.f32 %v1792_v49, %v4009_v28  ;;  %v3169_v0 = vpack.c.bf16 %v3405_v26, %v3404_v40  ;;  %v1794_v55 = vpop.f32.mrb[157].mxu1  ;;  %v2278_v31 = vpop.f32.mrb[103].mxu0  ;;  %v2159_v2 = vpack.c.bf16 %v2126_v34, %v2125_v39 }
 0x285   :  { %v3164_v44 = vpack.c.bf16 %v2278_v31, %v2275_v52  ;;  %v1795_v62 = vpop.f32.mrb[158].mxu1 }
 0x286   :  { %v2063_v19 = vadd.f32 %v4020_v45, %v1793_v10  ;;  %3313 = vst [vmem:[#allocation9 + $0x18] sm:$0xff] %v3169_v0   ;;  %v1796_v54 = vadd.f32 %v1795_v62, %v4013_v35  ;;  %v1797_v57 = vpop.f32.mrb[159].mxu1  ;;  %3458 = vmatprep.mubr.bf16.mxu0 %v2159_v2 }
 0x287   :  { %3312 = vst [vmem:[#allocation9 + $0x10] sm:$0xff] %v3164_v44  }
 0x288   :  { %v2064_v53 = vadd.f32 %v4020_v45, %v1796_v54  ;;  %v2127_v1 = vmax.f32 %v2063_v19, 0.0 }
 0x28a   :  { %v2128_v36 = vmax.f32 %v2064_v53, 0.0 }
 0x28c   :  { %v2160_v48 = vpack.c.bf16 %v2128_v36, %v2127_v1 }
 0x28e   :  { %3459 = vmatmul.mubr.bf16.gmra.mrb[156].mxu0 %v2160_v48 }
 0x291   :  { %v3408_v28 = vpop.f32.mrb[104].mxu0 }
 0x292   :  { %v2291_v5 = vpop.f32.mrb[105].mxu0 }
 0x293   :  { %v3409_v41 = vpop.f32.mrb[106].mxu0 }
 0x294   :  { %v3179_v60 = vpack.c.bf16 %v3409_v41, %v3408_v28  ;;  %v2294_v13 = vpop.f32.mrb[107].mxu0 }
 0x295   :  { %v3174_v7 = vpack.c.bf16 %v2294_v13, %v2291_v5 }
 0x296   :  { %3315 = vst [vmem:[#allocation9 + $0x28] sm:$0xff] %v3179_v60  }
 0x297   :  { %3314 = vst [vmem:[#allocation9 + $0x20] sm:$0xff] %v3174_v7  }
 0x2a1   :  { %v3412_v37 = vpop.f32.mrb[108].mxu0 }
 0x2a2   :  { %v2307_v30 = vpop.f32.mrb[109].mxu0 }
 0x2a3   :  { %v3413_v35 = vpop.f32.mrb[110].mxu0 }
 0x2a4   :  { %v3189_v14 = vpack.c.bf16 %v3413_v35, %v3412_v37  ;;  %v2310_v59 = vpop.f32.mrb[111].mxu0 }
 0x2a5   :  { %v3184_v46 = vpack.c.bf16 %v2310_v59, %v2307_v30 }
 0x2a6   :  { %3317 = vst [vmem:[#allocation9 + $0x38] sm:$0xff] %v3189_v14  }
 0x2a7   :  { %3316 = vst [vmem:[#allocation9 + $0x30] sm:$0xff] %v3184_v46  }
 0x2b1   :  { %v3416_v45 = vpop.f32.mrb[112].mxu0 }
 0x2b2   :  { %v2323_v12 = vpop.f32.mrb[113].mxu0 }
 0x2b3   :  { %v3417_v43 = vpop.f32.mrb[114].mxu0 }
 0x2b4   :  { %v3199_v51 = vpack.c.bf16 %v3417_v43, %v3416_v45  ;;  %v2326_v47 = vpop.f32.mrb[115].mxu0 }
 0x2b5   :  { %v3194_v17 = vpack.c.bf16 %v2326_v47, %v2323_v12 }
 0x2b6   :  { %3319 = vst [vmem:[#allocation9 + $0x48] sm:$0xff] %v3199_v51  }
 0x2b7   :  { %3318 = vst [vmem:[#allocation9 + $0x40] sm:$0xff] %v3194_v17  }
 0x2c1   :  { %v3420_v22 = vpop.f32.mrb[116].mxu0 }
 0x2c2   :  { %v2339_v18 = vpop.f32.mrb[117].mxu0 }
 0x2c3   :  { %v3421_v15 = vpop.f32.mrb[118].mxu0 }
 0x2c4   :  { %v3209_v11 = vpack.c.bf16 %v3421_v15, %v3420_v22  ;;  %v2342_v63 = vpop.f32.mrb[119].mxu0 }
 0x2c5   :  { %v3204_v56 = vpack.c.bf16 %v2342_v63, %v2339_v18 }
 0x2c6   :  { %3321 = vst [vmem:[#allocation9 + $0x58] sm:$0xff] %v3209_v11  }
 0x2c7   :  { %3320 = vst [vmem:[#allocation9 + $0x50] sm:$0xff] %v3204_v56  }
 0x2d1   :  { %v3424_v42 = vpop.f32.mrb[120].mxu0 }
 0x2d2   :  { %v2355_v24 = vpop.f32.mrb[121].mxu0 }
 0x2d3   :  { %v3425_v33 = vpop.f32.mrb[122].mxu0 }
 0x2d4   :  { %v3219_v58 = vpack.c.bf16 %v3425_v33, %v3424_v42  ;;  %v2358_v9 = vpop.f32.mrb[123].mxu0 }
 0x2d5   :  { %v3214_v61 = vpack.c.bf16 %v2358_v9, %v2355_v24 }
 0x2d6   :  { %3323 = vst [vmem:[#allocation9 + $0x68] sm:$0xff] %v3219_v58  }
 0x2d7   :  { %3322 = vst [vmem:[#allocation9 + $0x60] sm:$0xff] %v3214_v61  }
 0x2e1   :  { %v3428_v32 = vpop.f32.mrb[124].mxu0 }
 0x2e2   :  { %v2371_v6 = vpop.f32.mrb[125].mxu0 }
 0x2e3   :  { %v3429_v25 = vpop.f32.mrb[126].mxu0 }
 0x2e4   :  { %v3229_v29 = vpack.c.bf16 %v3429_v25, %v3428_v32  ;;  %v2374_v38 = vpop.f32.mrb[127].mxu0 }
 0x2e5   :  { %v3224_v27 = vpack.c.bf16 %v2374_v38, %v2371_v6 }
 0x2e6   :  { %3325 = vst [vmem:[#allocation9 + $0x78] sm:$0xff] %v3229_v29  }
 0x2e7   :  { %3324 = vst [vmem:[#allocation9 + $0x70] sm:$0xff] %v3224_v27  }
 0x2f1   :  { %v3432_v3 = vpop.f32.mrb[128].mxu0 }
 0x2f2   :  { %v2387_v16 = vpop.f32.mrb[129].mxu0 }
 0x2f3   :  { %v3433_v23 = vpop.f32.mrb[130].mxu0 }
 0x2f4   :  { %v3239_v50 = vpack.c.bf16 %v3433_v23, %v3432_v3  ;;  %v2390_v21 = vpop.f32.mrb[131].mxu0 }
 0x2f5   :  { %v3234_v4 = vpack.c.bf16 %v2390_v21, %v2387_v16 }
 0x2f6   :  { %3327 = vst [vmem:[#allocation9 + $0x88] sm:$0xff] %v3239_v50  }
 0x2f7   :  { %3326 = vst [vmem:[#allocation9 + $0x80] sm:$0xff] %v3234_v4  }
 0x301   :  { %v3436_v20 = vpop.f32.mrb[132].mxu0 }
 0x302   :  { %v2403_v8 = vpop.f32.mrb[133].mxu0 }
 0x303   :  { %v3437_v40 = vpop.f32.mrb[134].mxu0 }
 0x304   :  { %v3249_v39 = vpack.c.bf16 %v3437_v40, %v3436_v20  ;;  %v2406_v34 = vpop.f32.mrb[135].mxu0 }
 0x305   :  { %v3244_v52 = vpack.c.bf16 %v2406_v34, %v2403_v8 }
 0x306   :  { %3329 = vst [vmem:[#allocation9 + $0x98] sm:$0xff] %v3249_v39  }
 0x307   :  { %3328 = vst [vmem:[#allocation9 + $0x90] sm:$0xff] %v3244_v52  }
 0x311   :  { %v3440_v49 = vpop.f32.mrb[136].mxu0 }
 0x312   :  { %v2419_v26 = vpop.f32.mrb[137].mxu0 }
 0x313   :  { %v3441_v10 = vpop.f32.mrb[138].mxu0 }
 0x314   :  { %v3259_v0 = vpack.c.bf16 %v3441_v10, %v3440_v49  ;;  %v2422_v55 = vpop.f32.mrb[139].mxu0 }
 0x315   :  { %v3254_v31 = vpack.c.bf16 %v2422_v55, %v2419_v26 }
 0x316   :  { %3331 = vst [vmem:[#allocation9 + $0xa8] sm:$0xff] %v3259_v0  }
 0x317   :  { %3330 = vst [vmem:[#allocation9 + $0xa0] sm:$0xff] %v3254_v31  }
 0x321   :  { %v3444_v2 = vpop.f32.mrb[140].mxu0 }
 0x322   :  { %v2435_v44 = vpop.f32.mrb[141].mxu0 }
 0x323   :  { %v3445_v62 = vpop.f32.mrb[142].mxu0 }
 0x324   :  { %v3269_v19 = vpack.c.bf16 %v3445_v62, %v3444_v2  ;;  %v2438_v54 = vpop.f32.mrb[143].mxu0 }
 0x325   :  { %v3264_v57 = vpack.c.bf16 %v2438_v54, %v2435_v44 }
 0x326   :  { %3333 = vst [vmem:[#allocation9 + $0xb8] sm:$0xff] %v3269_v19  }
 0x327   :  { %3332 = vst [vmem:[#allocation9 + $0xb0] sm:$0xff] %v3264_v57  }
 0x331   :  { %v3448_v53 = vpop.f32.mrb[144].mxu0 }
 0x332   :  { %v2451_v1 = vpop.f32.mrb[145].mxu0 }
 0x333   :  { %v3449_v36 = vpop.f32.mrb[146].mxu0 }
 0x334   :  { %v3279_v48 = vpack.c.bf16 %v3449_v36, %v3448_v53  ;;  %v2454_v28 = vpop.f32.mrb[147].mxu0 }
 0x335   :  { %v3274_v5 = vpack.c.bf16 %v2454_v28, %v2451_v1 }
 0x336   :  { %3335 = vst [vmem:[#allocation9 + $0xc8] sm:$0xff] %v3279_v48  }
 0x337   :  { %3334 = vst [vmem:[#allocation9 + $0xc0] sm:$0xff] %v3274_v5  }
 0x341   :  { %v3452_v41 = vpop.f32.mrb[148].mxu0 }
 0x342   :  { %v2467_v60 = vpop.f32.mrb[149].mxu0 }
 0x343   :  { %v3453_v13 = vpop.f32.mrb[150].mxu0 }
 0x344   :  { %v3289_v7 = vpack.c.bf16 %v3453_v13, %v3452_v41  ;;  %v2470_v37 = vpop.f32.mrb[151].mxu0 }
 0x345   :  { %v3284_v30 = vpack.c.bf16 %v2470_v37, %v2467_v60 }
 0x346   :  { %3337 = vst [vmem:[#allocation9 + $0xd8] sm:$0xff] %v3289_v7  }
 0x347   :  { %3336 = vst [vmem:[#allocation9 + $0xd0] sm:$0xff] %v3284_v30  }
 0x351   :  { %v3456_v35 = vpop.f32.mrb[152].mxu0 }
 0x352   :  { %v2483_v14 = vpop.f32.mrb[153].mxu0 }
 0x353   :  { %v3457_v59 = vpop.f32.mrb[154].mxu0 }
 0x354   :  { %v3299_v46 = vpack.c.bf16 %v3457_v59, %v3456_v35  ;;  %v2486_v45 = vpop.f32.mrb[155].mxu0 }
 0x355   :  { %v3294_v12 = vpack.c.bf16 %v2486_v45, %v2483_v14 }
 0x356   :  { %3339 = vst [vmem:[#allocation9 + $0xe8] sm:$0xff] %v3299_v46  }
 0x357   :  { %3338 = vst [vmem:[#allocation9 + $0xe0] sm:$0xff] %v3294_v12  }
 0x361   :  { %v3460_v43 = vpop.f32.mrb[156].mxu0 }
 0x362   :  { %v2499_v51 = vpop.f32.mrb[157].mxu0 }
 0x363   :  { %v3461_v47 = vpop.f32.mrb[158].mxu0 }
 0x364   :  { %v3309_v17 = vpack.c.bf16 %v3461_v47, %v3460_v43  ;;  %v2502_v22 = vpop.f32.mrb[159].mxu0 }
 0x365   :  { %v3304_v18 = vpack.c.bf16 %v2502_v22, %v2499_v51 }
 0x366   :  { %3341 = vst [vmem:[#allocation9 + $0xf8] sm:$0xff] %v3309_v17  }
 0x367   :  { %3340 = vst [vmem:[#allocation9 + $0xf0] sm:$0xff] %v3304_v18  }
 0x368   :  { %3812 = shalt.err (!%p3809_p0)
}
 0x369   :  { %s3813_s8 = scalar_lea.hbm %s4233_s4, 4096 }
 0x36a   :  { %p3814_p1 = scmp.ne.s32.totalorder %s4233_s4, %s3813_s8  ;;  %p3817_p2 = scmp.lt.u32.totalorder %s3813_s8, %s4233_s4 }
 0x36c   :  { %p3819_p3 = pnand %p3817_p2, %p3814_p1 }
 0x36e   :  { %3822 = shalt.err (!%p3819_p3)
}
 0x36f   :  { %2845 = dma.vmem_to_hbm [thread:$0]  %s2840_s30, 4096, %s4233_s4, [#allocation5], %s3830_s25, %s3830_s25, %s3831_s26  }
 0x370   :  { %3827 = dma.done.wait [#allocation5], 4096  }
 0x371   :  { %3828 = vsyncadd [#allocation5], 4294963200 }
 0x372   :  { %2849 = vsyncpa [#allocation4], 1 }
 0x373   :  { %2850 = vsyncpa [#allocation7], 1 }
 0x374   :  { %2851 = vsyncpa [#allocation5], 1 }

</bundles_post_ra>
